<compile_context>
chip_gen: v6e
topology: v6e:2x2x1
jax: 0.10.0
libtpu: 0.0.40
codegen_flags: <defaults>
</compile_context>

<pallas_src>
import jax
import jax.numpy as jnp
import numpy as np
from jax import lax
from jax.experimental import pallas as pl
from jax.experimental.pallas import tpu as pltpu

EPS = 1e-5


def down_kernel(x_ref, w1_ref, s1_ref, b1_ref, w2_ref, s2_ref, b2_ref,
                o_ref, f1_ref, f2_ref):
    H, Wp = x_ref.shape[1], x_ref.shape[2]
    Cin = x_ref.shape[3] // 2
    Hp = H // 2
    Cmid = w1_ref.shape[-1]
    npix = Hp * Wp
    off = Wp + 1                     # interior offset inside the flat scratch
    halo = Wp + 1                    # front / tail halo length (rows)

    # ---- 2x2 / stride-2 max-pool (bf16 load, f32 math on the VPU) ----
    x = x_ref[0].astype(jnp.float32)                      # (H, Wp, 2*Cin)
    wmax = jnp.maximum(x[:, :, :Cin], x[:, :, Cin:])      # pool over width
    wmax = wmax.reshape(Hp, 2, Wp, Cin)
    pooled = jnp.maximum(wmax[:, 0], wmax[:, 1])          # pool over height

    # ---- fill flattened, row-padded scratch for conv1 ----
    # halos re-zeroed every step (cheap: 2*(Wp+1) rows); interior overwritten.
    f1_ref[pl.ds(0, halo), :] = jnp.zeros((halo, Cin), jnp.float32)
    f1_ref[pl.ds(off + npix, halo), :] = jnp.zeros((halo, Cin), jnp.float32)
    f1_ref[pl.ds(off, npix), :] = pooled.reshape(npix, Cin)

    # column masks fixing dx=0 / dx=2 wrap-around of the flattened taps
    col = lax.broadcasted_iota(jnp.int32, (npix, 1), 0) % Wp
    lmask = col > 0
    rmask = col < Wp - 1

    def conv3x3(flat_ref, w_ref):
        # 9 contiguous taps -> one (npix, 9*C) bf16 im2col slab -> one MXU matmul
        taps = []
        for dy in range(3):
            for dx in range(3):
                win = flat_ref[pl.ds(dy * Wp + dx, npix), :]
                if dx == 0:
                    win = jnp.where(lmask, win, 0.0)
                elif dx == 2:
                    win = jnp.where(rmask, win, 0.0)
                taps.append(win)
        slab = jnp.concatenate(taps, axis=-1).astype(jnp.bfloat16)
        return jnp.dot(slab, w_ref[...], preferred_element_type=jnp.float32)

    # ---- conv1 (fused K = 9*Cin) + folded BN + ReLU ----
    acc1 = conv3x3(f1_ref, w1_ref)                        # (npix, Cmid) f32
    y1 = jnp.maximum(acc1 * s1_ref[...] + b1_ref[...], 0.0)

    # ---- conv2 (fused K = 9*Cmid) + folded BN + ReLU ----
    f2_ref[pl.ds(0, halo), :] = jnp.zeros((halo, Cmid), jnp.float32)
    f2_ref[pl.ds(off + npix, halo), :] = jnp.zeros((halo, Cmid), jnp.float32)
    f2_ref[pl.ds(off, npix), :] = y1
    acc2 = conv3x3(f2_ref, w2_ref)                        # (npix, Cout) f32
    y2 = jnp.maximum(acc2 * s2_ref[...] + b2_ref[...], 0.0)

    # ---- store: exact channel width (no zero-pad), bf16 writeback ----
    o_ref[0] = y2.astype(o_ref.dtype)


@jax.jit
def down_forward(x_nchw, w1, s1, b1, w2, s2, b2):
    """x_nchw: (N, Cin, H, W) float32.  Returns (N, Cout, H/2, W/2) float32."""
    N, Cin, H, W = x_nchw.shape
    assert H % 2 == 0 and W % 2 == 0, "Down requires even spatial dims"
    Hp, Wp = H // 2, W // 2
    assert Wp >= 2, "flat-scratch tap masks assume Wp >= 2"
    Cmid = w1.shape[0]
    Cout = w2.shape[0]
    npix = Hp * Wp
    flat_pad = (Hp + 2) * Wp + 2                  # flattened row-padded scratch

    # Single unavoidable layout change: NCHW -> NHWC (channels into lanes),
    # cast to bf16 for half the HBM DMA.  Grouping adjacent W pixels into the
    # lane dim (2*Cin) is a free reshape (no second HBM pass).
    x = (jnp.transpose(x_nchw, (0, 2, 3, 1))
         .astype(jnp.bfloat16)
         .reshape(N, H, Wp, 2 * Cin))

    # OIHW conv weights -> (kh*kw*Cin, Cout) matmul weights, bf16 for the MXU.
    w1m = jnp.transpose(w1, (2, 3, 1, 0)).reshape(9 * Cin, Cmid).astype(jnp.bfloat16)
    w2m = jnp.transpose(w2, (2, 3, 1, 0)).reshape(9 * Cmid, Cout).astype(jnp.bfloat16)
    s1m, b1m = s1.reshape(1, Cmid), b1.reshape(1, Cmid)
    s2m, b2m = s2.reshape(1, Cout), b2.reshape(1, Cout)

    # ---- VMEM budget (double-buffered blocks + scratches + live values) ----
    in_blk = H * Wp * 2 * Cin * 2                       # bf16 input block
    out_blk = npix * Cout * 2                           # bf16 output block
    w_bytes = (9 * Cin * Cmid + 9 * Cmid * Cout) * 2 + (Cmid + Cout) * 2 * 4
    scr = flat_pad * (Cin + Cmid) * 4                   # f32 flat scratches
    live = npix * (9 * max(Cin, Cmid) * 2 + (Cmid + Cout) * 4)
    est = 2 * (in_blk + out_blk + w_bytes) + scr + live
    vmem_limit = int(min(128 * 1024 * 1024, max(16 * 1024 * 1024, 2 * est)))

    cost = pl.CostEstimate(
        flops=2 * N * npix * 9 * (Cin * Cmid + Cmid * Cout),
        transcendentals=0,
        bytes_accessed=(x.size * 2 + N * npix * Cout * 2
                        + (9 * Cin * Cmid + 9 * Cmid * Cout) * 2
                        + (Cmid + Cout) * 2 * 4),
    )

    out = pl.pallas_call(
        down_kernel,
        out_shape=jax.ShapeDtypeStruct((N, npix, Cout), jnp.bfloat16),
        grid_spec=pltpu.PrefetchScalarGridSpec(
            num_scalar_prefetch=0,
            grid=(N,),
            in_specs=[
                pl.BlockSpec((1, H, Wp, 2 * Cin), lambda b: (b, 0, 0, 0)),
                pl.BlockSpec((9 * Cin, Cmid), lambda b: (0, 0)),
                pl.BlockSpec((1, Cmid), lambda b: (0, 0)),
                pl.BlockSpec((1, Cmid), lambda b: (0, 0)),
                pl.BlockSpec((9 * Cmid, Cout), lambda b: (0, 0)),
                pl.BlockSpec((1, Cout), lambda b: (0, 0)),
                pl.BlockSpec((1, Cout), lambda b: (0, 0)),
            ],
            out_specs=pl.BlockSpec((1, npix, Cout), lambda b: (b, 0, 0)),
            scratch_shapes=[
                pltpu.VMEM((flat_pad, Cin), jnp.float32),
                pltpu.VMEM((flat_pad, Cmid), jnp.float32),
            ],
        ),
        compiler_params=pltpu.CompilerParams(
            dimension_semantics=("parallel",),
            vmem_limit_bytes=vmem_limit),
        cost_estimate=cost,
    )(x, w1m, s1m, b1m, w2m, s2m, b2m)

    # back to NCHW f32 (one pass; upcast fused into the transpose)
    out = out.reshape(N, Hp, Wp, Cout)
    return jnp.transpose(out, (0, 3, 1, 2)).astype(jnp.float32)


def init_params(key, in_channels, out_channels):
    mid = out_channels  # DoubleConv default: mid_channels = out_channels
    ks = jax.random.split(key, 10)
    w1 = 0.2 * jax.random.normal(ks[0], (mid, in_channels, 3, 3), jnp.float32)
    w2 = 0.2 * jax.random.normal(ks[1], (out_channels, mid, 3, 3), jnp.float32)
    g1 = 1.0 + 0.1 * jax.random.normal(ks[2], (mid,), jnp.float32)
    be1 = 0.1 * jax.random.normal(ks[3], (mid,), jnp.float32)
    rm1 = 0.1 * jax.random.normal(ks[4], (mid,), jnp.float32)
    rv1 = jax.random.uniform(ks[5], (mid,), jnp.float32, 0.5, 1.5)
    g2 = 1.0 + 0.1 * jax.random.normal(ks[6], (out_channels,), jnp.float32)
    be2 = 0.1 * jax.random.normal(ks[7], (out_channels,), jnp.float32)
    rm2 = 0.1 * jax.random.normal(ks[8], (out_channels,), jnp.float32)
    rv2 = jax.random.uniform(ks[9], (out_channels,), jnp.float32, 0.5, 1.5)
    # fold BN (eval mode) into per-channel scale / bias
    s1 = g1 / jnp.sqrt(rv1 + EPS)
    b1 = be1 - rm1 * s1
    s2 = g2 / jnp.sqrt(rv2 + EPS)
    b2 = be2 - rm2 * s2
    raw = (w1, g1, be1, rm1, rv1, w2, g2, be2, rm2, rv2)
    folded = (w1, s1, b1, w2, s2, b2)
    return raw, folded


def ref_down(x, w1, g1, be1, rm1, rv1, w2, g2, be2, rm2, rv2):
    """Pure-JAX reference matching torch semantics (BN in eval mode)."""
    xp = lax.reduce_window(x, -jnp.inf, lax.max, (1, 1, 2, 2), (1, 1, 2, 2),
                           "VALID")
    dn = ("NCHW", "OIHW", "NCHW")

    def bn(y, g, be, rm, rv):
        return ((y - rm[None, :, None, None]) /
                jnp.sqrt(rv + EPS)[None, :, None, None] *
                g[None, :, None, None] + be[None, :, None, None])

    y = lax.conv_general_dilated(xp, w1, (1, 1), "SAME", dimension_numbers=dn)
    y = jnp.maximum(bn(y, g1, be1, rm1, rv1), 0.0)
    y = lax.conv_general_dilated(y, w2, (1, 1), "SAME", dimension_numbers=dn)
    y = jnp.maximum(bn(y, g2, be2, rm2, rv2), 0.0)
    return y


if __name__ == "__main__":
    key = jax.random.PRNGKey(0)
    kx, kp = jax.random.split(key)

    N, Cin, H, W = 2, 4, 16, 16
    Cout = 8
    x = jax.random.normal(kx, (N, Cin, H, W), jnp.float32)

    raw, folded = init_params(kp, Cin, Cout)
    w1, s1, b1, w2, s2, b2 = folded

    out = down_forward(x, w1, s1, b1, w2, s2, b2)
    out = jax.block_until_ready(out)

    ref = jax.block_until_ready(ref_down(x, *raw))
    np.testing.assert_allclose(np.asarray(out), np.asarray(ref),
                               atol=5e-2, rtol=5e-2)
    assert out.shape == (N, Cout, H // 2, W // 2)
    print("KERNEL_OK")
</pallas_src>

<mosaic_0001>
module attributes {stable_mosaic.version = 11 : i64} {
  func.func @down_kernel(%arg0: i32, %arg1: memref<1x16x8x8xbf16, #tpu.memory_space<vmem>>, %arg2: memref<36x8xbf16, #tpu.memory_space<vmem>>, %arg3: memref<1x8xf32, #tpu.memory_space<vmem>>, %arg4: memref<1x8xf32, #tpu.memory_space<vmem>>, %arg5: memref<72x8xbf16, #tpu.memory_space<vmem>>, %arg6: memref<1x8xf32, #tpu.memory_space<vmem>>, %arg7: memref<1x8xf32, #tpu.memory_space<vmem>>, %arg8: memref<1x64x8xbf16, #tpu.memory_space<vmem>>, %arg9: memref<82x4xf32, #tpu.memory_space<vmem>>, %arg10: memref<82x8xf32, #tpu.memory_space<vmem>>) attributes {dimension_semantics = [#tpu.dimension_semantics<parallel>], iteration_bounds = array<i64: 2>, scalar_prefetch = 0 : i64, scratch_operands = 2 : i64, tpu.core_type = #tpu.core_type<tc>, window_params = [{transform_indices = @transform_0, window_bounds = array<i64: 1, 16, 8, 8>}, {pipeline_mode = #tpu.pipeline_mode<synchronous>, transform_indices = @transform_1, window_bounds = array<i64: 36, 8>}, {pipeline_mode = #tpu.pipeline_mode<synchronous>, transform_indices = @transform_2, window_bounds = array<i64: 1, 8>}, {pipeline_mode = #tpu.pipeline_mode<synchronous>, transform_indices = @transform_3, window_bounds = array<i64: 1, 8>}, {pipeline_mode = #tpu.pipeline_mode<synchronous>, transform_indices = @transform_4, window_bounds = array<i64: 72, 8>}, {pipeline_mode = #tpu.pipeline_mode<synchronous>, transform_indices = @transform_5, window_bounds = array<i64: 1, 8>}, {pipeline_mode = #tpu.pipeline_mode<synchronous>, transform_indices = @transform_6, window_bounds = array<i64: 1, 8>}, {transform_indices = @transform_7, window_bounds = array<i64: 1, 64, 8>}]} {
    %c0 = arith.constant 0 : index
    %c0_0 = arith.constant 0 : index
    %c0_1 = arith.constant 0 : index
    %c0_2 = arith.constant 0 : index
    %0 = vector.load %arg1[%c0, %c0_0, %c0_1, %c0_2] : memref<1x16x8x8xbf16, #tpu.memory_space<vmem>>, vector<1x16x8x8xbf16>
    %1 = vector.shape_cast %0 : vector<1x16x8x8xbf16> to vector<16x8x8xbf16>
    %2 = arith.extf %1 : vector<16x8x8xbf16> to vector<16x8x8xf32>
    %3 = vector.extract_strided_slice %2 {offsets = [0, 0, 0], sizes = [16, 8, 4], strides = [1, 1, 1]} : vector<16x8x8xf32> to vector<16x8x4xf32>
    %4 = vector.extract_strided_slice %2 {offsets = [0, 0, 4], sizes = [16, 8, 4], strides = [1, 1, 1]} : vector<16x8x8xf32> to vector<16x8x4xf32>
    %5 = arith.maximumf %3, %4 : vector<16x8x4xf32>
    %6 = vector.shape_cast %5 : vector<16x8x4xf32> to vector<8x2x8x4xf32>
    %7 = vector.extract_strided_slice %6 {offsets = [0, 0, 0, 0], sizes = [8, 1, 8, 4], strides = [1, 1, 1, 1]} : vector<8x2x8x4xf32> to vector<8x1x8x4xf32>
    %8 = vector.shape_cast %7 : vector<8x1x8x4xf32> to vector<8x8x4xf32>
    %9 = vector.extract_strided_slice %6 {offsets = [0, 1, 0, 0], sizes = [8, 1, 8, 4], strides = [1, 1, 1, 1]} : vector<8x2x8x4xf32> to vector<8x1x8x4xf32>
    %10 = vector.shape_cast %9 : vector<8x1x8x4xf32> to vector<8x8x4xf32>
    %11 = arith.maximumf %8, %10 : vector<8x8x4xf32>
    %cst = arith.constant 0.000000e+00 : f32
    %12 = vector.broadcast %cst : f32 to vector<9x4xf32>
    %c0_3 = arith.constant 0 : index
    %c0_4 = arith.constant 0 : index
    %13 = vector.load %arg9[%c0_3, %c0_4] : memref<82x4xf32, #tpu.memory_space<vmem>>, vector<9x4xf32>
    tpu.vector_store %arg9[%c0_3, %c0_4], %12 {strides = array<i32>} : memref<82x4xf32, #tpu.memory_space<vmem>>, vector<9x4xf32>,
    %cst_5 = arith.constant 0.000000e+00 : f32
    %14 = vector.broadcast %cst_5 : f32 to vector<9x4xf32>
    %c73 = arith.constant 73 : index
    %c0_6 = arith.constant 0 : index
    %15 = vector.load %arg9[%c73, %c0_6] : memref<82x4xf32, #tpu.memory_space<vmem>>, vector<9x4xf32>
    tpu.vector_store %arg9[%c73, %c0_6], %14 {strides = array<i32>} : memref<82x4xf32, #tpu.memory_space<vmem>>, vector<9x4xf32>,
    %16 = vector.shape_cast %11 : vector<8x8x4xf32> to vector<64x4xf32>
    %c9 = arith.constant 9 : index
    %c0_7 = arith.constant 0 : index
    %17 = vector.load %arg9[%c9, %c0_7] : memref<82x4xf32, #tpu.memory_space<vmem>>, vector<64x4xf32>
    tpu.vector_store %arg9[%c9, %c0_7], %16 {strides = array<i32>} : memref<82x4xf32, #tpu.memory_space<vmem>>, vector<64x4xf32>,
    %18 = tpu.iota {dimensions = array<i32: 0>} : vector<64x1xi32>
    %c8_i32 = arith.constant 8 : i32
    %c0_i32 = arith.constant 0 : i32
    %19 = arith.cmpi eq, %c8_i32, %c0_i32 : i32
    %c1_i32 = arith.constant 1 : i32
    %20 = arith.select %19, %c1_i32, %c8_i32 : i32
    %21 = vector.broadcast %20 : i32 to vector<64x1xi32>
    %22 = arith.remsi %18, %21 : vector<64x1xi32>
    %c0_i32_8 = arith.constant 0 : i32
    %23 = vector.broadcast %c0_i32_8 : i32 to vector<64x1xi32>
    %24 = arith.cmpi ne, %22, %23 : vector<64x1xi32>
    %c0_i32_9 = arith.constant 0 : i32
    %25 = vector.broadcast %c0_i32_9 : i32 to vector<64x1xi32>
    %26 = arith.cmpi slt, %22, %25 : vector<64x1xi32>
    %c0_i32_10 = arith.constant 0 : i32
    %27 = arith.cmpi slt, %20, %c0_i32_10 : i32
    %28 = vector.broadcast %27 : i1 to vector<64x1xi1>
    %29 = vector.broadcast %28 : vector<64x1xi1> to vector<64x1xi1>
    %30 = arith.xori %26, %29 : vector<64x1xi1>
    %31 = arith.andi %30, %24 : vector<64x1xi1>
    %32 = vector.broadcast %20 : i32 to vector<64x1xi32>
    %33 = arith.addi %22, %32 : vector<64x1xi32>
    %34 = arith.select %31, %33, %22 : vector<64x1xi1>, vector<64x1xi32>
    %c0_i32_11 = arith.constant 0 : i32
    %35 = vector.broadcast %c0_i32_11 : i32 to vector<64x1xi32>
    %36 = arith.cmpi sgt, %34, %35 : vector<64x1xi32>
    %c7_i32 = arith.constant 7 : i32
    %37 = vector.broadcast %c7_i32 : i32 to vector<64x1xi32>
    %38 = arith.cmpi slt, %34, %37 : vector<64x1xi32>
    %c0_12 = arith.constant 0 : index
    %c0_13 = arith.constant 0 : index
    %39 = vector.load %arg9[%c0_12, %c0_13] : memref<82x4xf32, #tpu.memory_space<vmem>>, vector<64x4xf32>
    %cst_14 = arith.constant 0.000000e+00 : f32
    %40 = vector.shape_cast %36 : vector<64x1xi1> to vector<64x1xi1>
    %41 = vector.broadcast %40 : vector<64x1xi1> to vector<64x4xi1>
    %42 = vector.broadcast %cst_14 : f32 to vector<64x4xf32>
    %43 = arith.select %41, %39, %42 : vector<64x4xi1>, vector<64x4xf32>
    %c1 = arith.constant 1 : index
    %c0_15 = arith.constant 0 : index
    %44 = vector.load %arg9[%c1, %c0_15] : memref<82x4xf32, #tpu.memory_space<vmem>>, vector<64x4xf32>
    %c2 = arith.constant 2 : index
    %c0_16 = arith.constant 0 : index
    %45 = vector.load %arg9[%c2, %c0_16] : memref<82x4xf32, #tpu.memory_space<vmem>>, vector<64x4xf32>
    %cst_17 = arith.constant 0.000000e+00 : f32
    %46 = vector.shape_cast %38 : vector<64x1xi1> to vector<64x1xi1>
    %47 = vector.broadcast %46 : vector<64x1xi1> to vector<64x4xi1>
    %48 = vector.broadcast %cst_17 : f32 to vector<64x4xf32>
    %49 = arith.select %47, %45, %48 : vector<64x4xi1>, vector<64x4xf32>
    %c8 = arith.constant 8 : index
    %c0_18 = arith.constant 0 : index
    %50 = vector.load %arg9[%c8, %c0_18] : memref<82x4xf32, #tpu.memory_space<vmem>>, vector<64x4xf32>
    %cst_19 = arith.constant 0.000000e+00 : f32
    %51 = vector.shape_cast %36 : vector<64x1xi1> to vector<64x1xi1>
    %52 = vector.broadcast %51 : vector<64x1xi1> to vector<64x4xi1>
    %53 = vector.broadcast %cst_19 : f32 to vector<64x4xf32>
    %54 = arith.select %52, %50, %53 : vector<64x4xi1>, vector<64x4xf32>
    %c9_20 = arith.constant 9 : index
    %c0_21 = arith.constant 0 : index
    %55 = vector.load %arg9[%c9_20, %c0_21] : memref<82x4xf32, #tpu.memory_space<vmem>>, vector<64x4xf32>
    %c10 = arith.constant 10 : index
    %c0_22 = arith.constant 0 : index
    %56 = vector.load %arg9[%c10, %c0_22] : memref<82x4xf32, #tpu.memory_space<vmem>>, vector<64x4xf32>
    %cst_23 = arith.constant 0.000000e+00 : f32
    %57 = vector.shape_cast %38 : vector<64x1xi1> to vector<64x1xi1>
    %58 = vector.broadcast %57 : vector<64x1xi1> to vector<64x4xi1>
    %59 = vector.broadcast %cst_23 : f32 to vector<64x4xf32>
    %60 = arith.select %58, %56, %59 : vector<64x4xi1>, vector<64x4xf32>
    %c16 = arith.constant 16 : index
    %c0_24 = arith.constant 0 : index
    %61 = vector.load %arg9[%c16, %c0_24] : memref<82x4xf32, #tpu.memory_space<vmem>>, vector<64x4xf32>
    %cst_25 = arith.constant 0.000000e+00 : f32
    %62 = vector.shape_cast %36 : vector<64x1xi1> to vector<64x1xi1>
    %63 = vector.broadcast %62 : vector<64x1xi1> to vector<64x4xi1>
    %64 = vector.broadcast %cst_25 : f32 to vector<64x4xf32>
    %65 = arith.select %63, %61, %64 : vector<64x4xi1>, vector<64x4xf32>
    %c17 = arith.constant 17 : index
    %c0_26 = arith.constant 0 : index
    %66 = vector.load %arg9[%c17, %c0_26] : memref<82x4xf32, #tpu.memory_space<vmem>>, vector<64x4xf32>
    %c18 = arith.constant 18 : index
    %c0_27 = arith.constant 0 : index
    %67 = vector.load %arg9[%c18, %c0_27] : memref<82x4xf32, #tpu.memory_space<vmem>>, vector<64x4xf32>
    %cst_28 = arith.constant 0.000000e+00 : f32
    %68 = vector.shape_cast %38 : vector<64x1xi1> to vector<64x1xi1>
    %69 = vector.broadcast %68 : vector<64x1xi1> to vector<64x4xi1>
    %70 = vector.broadcast %cst_28 : f32 to vector<64x4xf32>
    %71 = arith.select %69, %67, %70 : vector<64x4xi1>, vector<64x4xf32>
    %72 = tpu.concatenate %43, %44, %49, %54, %55, %60, %65, %66, %71 in 1 : vector<64x4xf32>, vector<64x4xf32>, vector<64x4xf32>, vector<64x4xf32>, vector<64x4xf32>, vector<64x4xf32>, vector<64x4xf32>, vector<64x4xf32>, vector<64x4xf32> -> vector<64x36xf32>
    %73 = arith.truncf %72 : vector<64x36xf32> to vector<64x36xbf16>
    %c0_29 = arith.constant 0 : index
    %c0_30 = arith.constant 0 : index
    %74 = vector.load %arg2[%c0_29, %c0_30] : memref<36x8xbf16, #tpu.memory_space<vmem>>, vector<36x8xbf16>
    %cst_31 = arith.constant dense<0.000000e+00> : vector<64x8xf32>
    %75 = tpu.matmul %73, %74, %cst_31 {dimension_numbers = #tpu.dot_dimension_numbers<[1], [0], [0], [1], [0, 0, 1, 1], [], []>} : vector<64x36xbf16>, vector<36x8xbf16>, vector<64x8xf32> -> vector<64x8xf32>
    %c0_32 = arith.constant 0 : index
    %c0_33 = arith.constant 0 : index
    %76 = vector.load %arg3[%c0_32, %c0_33] : memref<1x8xf32, #tpu.memory_space<vmem>>, vector<1x8xf32>
    %77 = vector.broadcast %76 : vector<1x8xf32> to vector<64x8xf32>
    %78 = arith.mulf %75, %77 : vector<64x8xf32>
    %c0_34 = arith.constant 0 : index
    %c0_35 = arith.constant 0 : index
    %79 = vector.load %arg4[%c0_34, %c0_35] : memref<1x8xf32, #tpu.memory_space<vmem>>, vector<1x8xf32>
    %80 = vector.broadcast %79 : vector<1x8xf32> to vector<64x8xf32>
    %81 = arith.addf %78, %80 : vector<64x8xf32>
    %cst_36 = arith.constant 0.000000e+00 : f32
    %82 = vector.broadcast %cst_36 : f32 to vector<64x8xf32>
    %83 = arith.maximumf %81, %82 : vector<64x8xf32>
    %cst_37 = arith.constant 0.000000e+00 : f32
    %84 = vector.broadcast %cst_37 : f32 to vector<9x8xf32>
    %c0_38 = arith.constant 0 : index
    %c0_39 = arith.constant 0 : index
    %85 = vector.load %arg10[%c0_38, %c0_39] : memref<82x8xf32, #tpu.memory_space<vmem>>, vector<9x8xf32>
    tpu.vector_store %arg10[%c0_38, %c0_39], %84 {strides = array<i32>} : memref<82x8xf32, #tpu.memory_space<vmem>>, vector<9x8xf32>,
    %cst_40 = arith.constant 0.000000e+00 : f32
    %86 = vector.broadcast %cst_40 : f32 to vector<9x8xf32>
    %c73_41 = arith.constant 73 : index
    %c0_42 = arith.constant 0 : index
    %87 = vector.load %arg10[%c73_41, %c0_42] : memref<82x8xf32, #tpu.memory_space<vmem>>, vector<9x8xf32>
    tpu.vector_store %arg10[%c73_41, %c0_42], %86 {strides = array<i32>} : memref<82x8xf32, #tpu.memory_space<vmem>>, vector<9x8xf32>,
    %c9_43 = arith.constant 9 : index
    %c0_44 = arith.constant 0 : index
    %88 = vector.load %arg10[%c9_43, %c0_44] : memref<82x8xf32, #tpu.memory_space<vmem>>, vector<64x8xf32>
    tpu.vector_store %arg10[%c9_43, %c0_44], %83 {strides = array<i32>} : memref<82x8xf32, #tpu.memory_space<vmem>>, vector<64x8xf32>,
    %c0_45 = arith.constant 0 : index
    %c0_46 = arith.constant 0 : index
    %89 = vector.load %arg10[%c0_45, %c0_46] : memref<82x8xf32, #tpu.memory_space<vmem>>, vector<64x8xf32>
    %cst_47 = arith.constant 0.000000e+00 : f32
    %90 = vector.shape_cast %36 : vector<64x1xi1> to vector<64x1xi1>
    %91 = vector.broadcast %90 : vector<64x1xi1> to vector<64x8xi1>
    %92 = vector.broadcast %cst_47 : f32 to vector<64x8xf32>
    %93 = arith.select %91, %89, %92 : vector<64x8xi1>, vector<64x8xf32>
    %c1_48 = arith.constant 1 : index
    %c0_49 = arith.constant 0 : index
    %94 = vector.load %arg10[%c1_48, %c0_49] : memref<82x8xf32, #tpu.memory_space<vmem>>, vector<64x8xf32>
    %c2_50 = arith.constant 2 : index
    %c0_51 = arith.constant 0 : index
    %95 = vector.load %arg10[%c2_50, %c0_51] : memref<82x8xf32, #tpu.memory_space<vmem>>, vector<64x8xf32>
    %cst_52 = arith.constant 0.000000e+00 : f32
    %96 = vector.shape_cast %38 : vector<64x1xi1> to vector<64x1xi1>
    %97 = vector.broadcast %96 : vector<64x1xi1> to vector<64x8xi1>
    %98 = vector.broadcast %cst_52 : f32 to vector<64x8xf32>
    %99 = arith.select %97, %95, %98 : vector<64x8xi1>, vector<64x8xf32>
    %c8_53 = arith.constant 8 : index
    %c0_54 = arith.constant 0 : index
    %100 = vector.load %arg10[%c8_53, %c0_54] : memref<82x8xf32, #tpu.memory_space<vmem>>, vector<64x8xf32>
    %cst_55 = arith.constant 0.000000e+00 : f32
    %101 = vector.shape_cast %36 : vector<64x1xi1> to vector<64x1xi1>
    %102 = vector.broadcast %101 : vector<64x1xi1> to vector<64x8xi1>
    %103 = vector.broadcast %cst_55 : f32 to vector<64x8xf32>
    %104 = arith.select %102, %100, %103 : vector<64x8xi1>, vector<64x8xf32>
    %c9_56 = arith.constant 9 : index
    %c0_57 = arith.constant 0 : index
    %105 = vector.load %arg10[%c9_56, %c0_57] : memref<82x8xf32, #tpu.memory_space<vmem>>, vector<64x8xf32>
    %c10_58 = arith.constant 10 : index
    %c0_59 = arith.constant 0 : index
    %106 = vector.load %arg10[%c10_58, %c0_59] : memref<82x8xf32, #tpu.memory_space<vmem>>, vector<64x8xf32>
    %cst_60 = arith.constant 0.000000e+00 : f32
    %107 = vector.shape_cast %38 : vector<64x1xi1> to vector<64x1xi1>
    %108 = vector.broadcast %107 : vector<64x1xi1> to vector<64x8xi1>
    %109 = vector.broadcast %cst_60 : f32 to vector<64x8xf32>
    %110 = arith.select %108, %106, %109 : vector<64x8xi1>, vector<64x8xf32>
    %c16_61 = arith.constant 16 : index
    %c0_62 = arith.constant 0 : index
    %111 = vector.load %arg10[%c16_61, %c0_62] : memref<82x8xf32, #tpu.memory_space<vmem>>, vector<64x8xf32>
    %cst_63 = arith.constant 0.000000e+00 : f32
    %112 = vector.shape_cast %36 : vector<64x1xi1> to vector<64x1xi1>
    %113 = vector.broadcast %112 : vector<64x1xi1> to vector<64x8xi1>
    %114 = vector.broadcast %cst_63 : f32 to vector<64x8xf32>
    %115 = arith.select %113, %111, %114 : vector<64x8xi1>, vector<64x8xf32>
    %c17_64 = arith.constant 17 : index
    %c0_65 = arith.constant 0 : index
    %116 = vector.load %arg10[%c17_64, %c0_65] : memref<82x8xf32, #tpu.memory_space<vmem>>, vector<64x8xf32>
    %c18_66 = arith.constant 18 : index
    %c0_67 = arith.constant 0 : index
    %117 = vector.load %arg10[%c18_66, %c0_67] : memref<82x8xf32, #tpu.memory_space<vmem>>, vector<64x8xf32>
    %cst_68 = arith.constant 0.000000e+00 : f32
    %118 = vector.shape_cast %38 : vector<64x1xi1> to vector<64x1xi1>
    %119 = vector.broadcast %118 : vector<64x1xi1> to vector<64x8xi1>
    %120 = vector.broadcast %cst_68 : f32 to vector<64x8xf32>
    %121 = arith.select %119, %117, %120 : vector<64x8xi1>, vector<64x8xf32>
    %122 = tpu.concatenate %93, %94, %99, %104, %105, %110, %115, %116, %121 in 1 : vector<64x8xf32>, vector<64x8xf32>, vector<64x8xf32>, vector<64x8xf32>, vector<64x8xf32>, vector<64x8xf32>, vector<64x8xf32>, vector<64x8xf32>, vector<64x8xf32> -> vector<64x72xf32>
    %123 = arith.truncf %122 : vector<64x72xf32> to vector<64x72xbf16>
    %c0_69 = arith.constant 0 : index
    %c0_70 = arith.constant 0 : index
    %124 = vector.load %arg5[%c0_69, %c0_70] : memref<72x8xbf16, #tpu.memory_space<vmem>>, vector<72x8xbf16>
    %cst_71 = arith.constant dense<0.000000e+00> : vector<64x8xf32>
    %125 = tpu.matmul %123, %124, %cst_71 {dimension_numbers = #tpu.dot_dimension_numbers<[1], [0], [0], [1], [0, 0, 1, 1], [], []>} : vector<64x72xbf16>, vector<72x8xbf16>, vector<64x8xf32> -> vector<64x8xf32>
    %c0_72 = arith.constant 0 : index
    %c0_73 = arith.constant 0 : index
    %126 = vector.load %arg6[%c0_72, %c0_73] : memref<1x8xf32, #tpu.memory_space<vmem>>, vector<1x8xf32>
    %127 = vector.broadcast %126 : vector<1x8xf32> to vector<64x8xf32>
    %128 = arith.mulf %125, %127 : vector<64x8xf32>
    %c0_74 = arith.constant 0 : index
    %c0_75 = arith.constant 0 : index
    %129 = vector.load %arg7[%c0_74, %c0_75] : memref<1x8xf32, #tpu.memory_space<vmem>>, vector<1x8xf32>
    %130 = vector.broadcast %129 : vector<1x8xf32> to vector<64x8xf32>
    %131 = arith.addf %128, %130 : vector<64x8xf32>
    %cst_76 = arith.constant 0.000000e+00 : f32
    %132 = vector.broadcast %cst_76 : f32 to vector<64x8xf32>
    %133 = arith.maximumf %131, %132 : vector<64x8xf32>
    %134 = arith.truncf %133 : vector<64x8xf32> to vector<64x8xbf16>
    %c0_77 = arith.constant 0 : index
    %c0_78 = arith.constant 0 : index
    %c0_79 = arith.constant 0 : index
    %135 = vector.load %arg8[%c0_77, %c0_78, %c0_79] : memref<1x64x8xbf16, #tpu.memory_space<vmem>>, vector<1x64x8xbf16>
    %136 = vector.shape_cast %135 : vector<1x64x8xbf16> to vector<64x8xbf16>
    %137 = vector.shape_cast %134 : vector<64x8xbf16> to vector<1x64x8xbf16>
    tpu.vector_store %arg8[%c0_77, %c0_78, %c0_79], %137 {strides = array<i32>} : memref<1x64x8xbf16, #tpu.memory_space<vmem>>, vector<1x64x8xbf16>,
    return
  }
  func.func @transform_0(%arg0: i32) -> (i32, i32, i32, i32) {
    %c0_i32 = arith.constant 0 : i32
    %c0_i32_0 = arith.constant 0 : i32
    %c0_i32_1 = arith.constant 0 : i32
    %c0_i32_2 = arith.constant 0 : i32
    return %arg0, %c0_i32, %c0_i32_0, %c0_i32_1 : i32, i32, i32, i32
  }
  func.func @transform_1(%arg0: i32) -> (i32, i32) {
    %c0_i32 = arith.constant 0 : i32
    %c0_i32_0 = arith.constant 0 : i32
    %c0_i32_1 = arith.constant 0 : i32
    return %c0_i32, %c0_i32_0 : i32, i32
  }
  func.func @transform_2(%arg0: i32) -> (i32, i32) {
    %c0_i32 = arith.constant 0 : i32
    %c0_i32_0 = arith.constant 0 : i32
    %c0_i32_1 = arith.constant 0 : i32
    return %c0_i32, %c0_i32_0 : i32, i32
  }
  func.func @transform_3(%arg0: i32) -> (i32, i32) {
    %c0_i32 = arith.constant 0 : i32
    %c0_i32_0 = arith.constant 0 : i32
    %c0_i32_1 = arith.constant 0 : i32
    return %c0_i32, %c0_i32_0 : i32, i32
  }
  func.func @transform_4(%arg0: i32) -> (i32, i32) {
    %c0_i32 = arith.constant 0 : i32
    %c0_i32_0 = arith.constant 0 : i32
    %c0_i32_1 = arith.constant 0 : i32
    return %c0_i32, %c0_i32_0 : i32, i32
  }
  func.func @transform_5(%arg0: i32) -> (i32, i32) {
    %c0_i32 = arith.constant 0 : i32
    %c0_i32_0 = arith.constant 0 : i32
    %c0_i32_1 = arith.constant 0 : i32
    return %c0_i32, %c0_i32_0 : i32, i32
  }
  func.func @transform_6(%arg0: i32) -> (i32, i32) {
    %c0_i32 = arith.constant 0 : i32
    %c0_i32_0 = arith.constant 0 : i32
    %c0_i32_1 = arith.constant 0 : i32
    return %c0_i32, %c0_i32_0 : i32, i32
  }
  func.func @transform_7(%arg0: i32) -> (i32, i32, i32) {
    %c0_i32 = arith.constant 0 : i32
    %c0_i32_0 = arith.constant 0 : i32
    %c0_i32_1 = arith.constant 0 : i32
    return %arg0, %c0_i32, %c0_i32_0 : i32, i32, i32
  }
}

</mosaic_0001>

<bundles_post_ra>
// kernel: down_forward.1
= control target key start
LH: loop header
LB: loop body
LE: loop exit
PB: predicated region body
PF: predicated region fallthrough
CT: control target
= control target key end

     0   :  { %s2349_s24 = smov 0   ;;  %s3121_s0 = inlined_call_operand.vmem [shape: bf16[2,16,8,8], index: 0, kind: input, shape index: {}]   ;;  %s3122_s1 = inlined_call_operand.vmem [shape: bf16[36,8], index: 1, kind: input, shape index: {}]   ;;  %s3123_s2 = inlined_call_operand.vmem [shape: f32[1,8], index: 2, kind: input, shape index: {}]   ;;  %s3124_s3 = inlined_call_operand.vmem [shape: f32[1,8], index: 3, kind: input, shape index: {}]   ;;  %s3125_s4 = inlined_call_operand.vmem [shape: bf16[72,8], index: 4, kind: input, shape index: {}]   ;;  %s3126_s5 = inlined_call_operand.vmem [shape: f32[1,8], index: 5, kind: input, shape index: {}]   ;;  %s3127_s6 = inlined_call_operand.vmem [shape: f32[1,8], index: 6, kind: input, shape index: {}]   ;;  %s3128_s7 = inlined_call_operand.vmem [shape: bf16[2,64,8], index: 7, kind: output, shape index: {}]  }
   0x1 LB: > { %s1759_s25 = sadd.s32 4294967295, %s2293_s24   ;;  %p1763_p0 = scmp.ge.s32.totalorder %s2293_s24, 1  ;;  %s2293_s24 = sphi %s2349_s24, %s17_s24  }
   0x2   : > { %p237_p1 = scmp.lt.s32.totalorder %s2293_s24, 3 }
   0x4   : > { %p238_p2 = pnand %p1763_p0, %p237_p1 }
   0x5   : > { %p269_p3 = scmp.lt.s32.totalorder (!%p238_p2), %s1759_s25, 1  ;;  %s2296_s30 = smov (!%p238_p2), 124  }
   0x6   : > { %241 = sbr.rel (%p238_p2) target bundleno = 920 (0x398), region = 48  ;;  %s2297_s8 = smov (!%p238_p2), 4  }
   0x7   : > { %s2298_s9 = smov (!%p238_p2), 16   ;;  %s2299_s10 = smov (!%p238_p2), 28  }
   0x8   : > { %s2300_s11 = smov (!%p238_p2), 8   ;;  %s2301_s12 = smov (!%p238_p2), 12  }
   0x9   : > { %s2302_s15 = smov (!%p238_p2), 20   ;;  %s2303_s18 = smov (!%p238_p2), 24  }
   0xa   : > { %s2304_s21 = smov (!%p238_p2), 32   ;;  %s2305_s28 = smov (!%p238_p2), 56  }
   0xb   : > { %s3280_s25 = smov (!%p269_p3, %s1759_s25), 1  ;;  %vm3130_vm0 = vcmask 31744   ;;  %vm402_vm1 = vcmask 24576   ;;  %v2295_v0 = vmov 0.0   ;;  %vm3129_vm6 = vcmask 64512   ;;  %s2307_s13 = smov 48  }
   0xc   : > { %s1798_s26 = sshll.u32 %s3280_s25, 6  ;;  %401 = vst.msk [vmem:[#allocation2] sm:$0xff] %vm3130_vm0, %v2295_v0  ;;  %404 = vst.msk [vmem:[#allocation2 + $0x49] sm:$0xff] %vm3130_vm0, %v2295_v0  ;;  %vm995_vm9 = vcmask 1041408   ;;  %s2308_s16 = smov 64  }
   0xd   : > { %s2363_s29 = scalar_lea.vmem %s3121_s0, %s1798_s26  ;;  %403 = vst.msk [vmem:[#allocation2 + $0x8] sm:$0x1] %vm402_vm1, %v2295_v0  ;;  %405 = vst.msk [vmem:[#allocation2 + $0x51] sm:$0x1] %vm402_vm1, %v2295_v0  ;;  %s1799_s23 = sshll.u32 %s3280_s25, 5 }
   0xe   : > { %v1841_v1 = vld [vmem:[%s2363_s29 + $0x10] sm:$0xff]   ;;  %v1809_v2 = vld [vmem:[%s2363_s29] sm:$0xff]   ;;  %v1842_v3 = vld [vmem:[%s2363_s29 + $0x18] sm:$0xff]   ;;  %1102 = vst.msk [vmem:[#allocation3] sm:$0xff] %vm3129_vm6, %v2295_v0 }
   0xf   : > { %v1818_v4 = vunpack.c.l.bf16 %v1841_v1  ;;  %v1819_v5 = vunpack.c.h.bf16 %v1841_v1  ;;  %v1810_v6 = vunpack.c.l.bf16 %v1809_v2  ;;  %v1811_v7 = vunpack.c.h.bf16 %v1809_v2  ;;  %v1840_v8 = vld [vmem:[%s2363_s29 + $0x8] sm:$0xff]   ;;  %v2379_v14 = vld [vmem:[%s2363_s29 + $0x20] sm:$0xff]   ;;  %v2386_v23 = vld [vmem:[%s2363_s29 + $0x30] sm:$0xff]   ;;  %1105 = vst.msk [vmem:[#allocation3 + $0x49] sm:$0xff] %vm3129_vm6, %v2295_v0 }
  0x10   : > { %v2376_v9 = vld [vmem:[%s2363_s29 + $0x28] sm:$0xff]   ;;  %v1822_v10 = vunpack.c.l.bf16 %v1842_v3  ;;  %v1823_v11 = vunpack.c.h.bf16 %v1842_v3  ;;  %v1814_v12 = vunpack.c.l.bf16 %v1840_v8  ;;  %v1815_v13 = vunpack.c.h.bf16 %v1840_v8  ;;  %v2389_v24 = vld [vmem:[%s2363_s29 + $0x38] sm:$0xff]  }
  0x11   : > { %v1929_v15 = vpack.i.bf16 %v1819_v5, %v1818_v4  ;;  %v1919_v16 = vpack.i.bf16 %v1811_v7, %v1810_v6  ;;  %v1830_v17 = vunpack.c.l.bf16 %v2376_v9  ;;  %v1831_v18 = vunpack.c.h.bf16 %v2376_v9 }
  0x12   : > { %v1934_v19 = vpack.i.bf16 %v1823_v11, %v1822_v10  ;;  %v1924_v20 = vpack.i.bf16 %v1815_v13, %v1814_v12  ;;  %v1826_v21 = vunpack.c.l.bf16 %v2379_v14  ;;  %v1827_v22 = vunpack.c.h.bf16 %v2379_v14 }
  0x13   : > { %1930 = vrot.lane.b32.xlu1 %v1929_v15, %s2296_s30  ;;  %1920 = vrot.lane.b32.xlu0 %v1919_v16, %s2296_s30  ;;  %v1944_v25 = vpack.i.bf16 %v1831_v18, %v1830_v17  ;;  %v1834_v26 = vunpack.c.l.bf16 %v2386_v23  ;;  %v1835_v28 = vunpack.c.h.bf16 %v2386_v23  ;;  %v1838_v29 = vunpack.c.l.bf16 %v2389_v24 }
  0x14   : > { %v1939_v27 = vpack.i.bf16 %v1827_v22, %v1826_v21  ;;  %v1839_v30 = vunpack.c.h.bf16 %v2389_v24 }
  0x15   : > { %v1949_v31 = vpack.i.bf16 %v1835_v28, %v1834_v26 }
  0x16   : > { %v1954_v32 = vpack.i.bf16 %v1839_v30, %v1838_v29 }
  0x17   : > { %1935 = vrot.lane.b32.xlu1 %v1934_v19, %s2296_s30  ;;  %1925 = vrot.lane.b32.xlu0 %v1924_v20, %s2296_s30  ;;  %v414_v19 = vlaneseq }
  0x1b   : > { %1945 = vrot.lane.b32.xlu1 %v1944_v25, %s2296_s30  ;;  %1940 = vrot.lane.b32.xlu0 %v1939_v27, %s2296_s30 }
  0x1f   : > { %1950 = vrot.lane.b32.xlu0 %v1949_v31, %s2296_s30  ;;  %1955 = vrot.lane.b32.xlu1 %v1954_v32, %s2296_s30 }
  0x85   : > { %v1931_v33 = vpop.permute.xlu1 %1930  ;;  %v1921_v34 = vpop.permute.xlu0 %1920 }
  0x86   : > { %v1933_v35 = vunpack.i.h.bf16 %v1931_v33  ;;  %v1932_v36 = vunpack.i.l.bf16 %v1931_v33  ;;  %v1923_v37 = vunpack.i.h.bf16 %v1921_v34  ;;  %v1922_v38 = vunpack.i.l.bf16 %v1921_v34 }
  0x88   : > { %v381_v39 = vmax.f32 %v1819_v5, %v1933_v35  ;;  %v380_v40 = vmax.f32 %v1818_v4, %v1932_v36  ;;  %v377_v41 = vmax.f32 %v1811_v7, %v1923_v37  ;;  %v376_v42 = vmax.f32 %v1810_v6, %v1922_v38  ;;  %v567_v6 = vld [vmem:[#allocation2 + $0x1] sm:$0xff] }
  0x89   : > { %v1936_v43 = vpop.permute.xlu1 %1935  ;;  %v1926_v44 = vpop.permute.xlu0 %1925 }
  0x8a   : > { %v394_v45 = vmax.f32 %v380_v40, %v381_v39  ;;  %v392_v46 = vmax.f32 %v376_v42, %v377_v41  ;;  %v1938_v47 = vunpack.i.h.bf16 %v1936_v43  ;;  %v1937_v48 = vunpack.i.l.bf16 %v1936_v43 }
  0x8b   : > { %v1928_v49 = vunpack.i.h.bf16 %v1926_v44  ;;  %v1927_v50 = vunpack.i.l.bf16 %v1926_v44  ;;  %v3156_v40 = vmov 0 }
  0x8c   : > { %408 = vst.msk [vmem:[#allocation2 + $0x19] sm:$0xff] %vm3130_vm0, %v394_v45  ;;  %406 = vst.msk [vmem:[#allocation2 + $0x9] sm:$0xff] %vm3130_vm0, %v392_v46  ;;  %v383_v51 = vmax.f32 %v1823_v11, %v1938_v47  ;;  %v382_v52 = vmax.f32 %v1822_v10, %v1937_v48  ;;  %v3158_v48 = vmov 0 }
  0x8d   : > { %v379_v53 = vmax.f32 %v1815_v13, %v1928_v49  ;;  %v378_v54 = vmax.f32 %v1814_v12, %v1927_v50  ;;  %v1946_v55 = vpop.permute.xlu1 %1945  ;;  %v1941_v56 = vpop.permute.xlu0 %1940  ;;  %v3160_v49 = vmov 0 }
  0x8e   : > { %v395_v57 = vmax.f32 %v382_v52, %v383_v51  ;;  %v1948_v58 = vunpack.i.h.bf16 %v1946_v55  ;;  %v1947_v59 = vunpack.i.l.bf16 %v1946_v55  ;;  %v1943_v60 = vunpack.i.h.bf16 %v1941_v56 }
  0x8f   : > { %v393_v61 = vmax.f32 %v378_v54, %v379_v53  ;;  %v1942_v62 = vunpack.i.l.bf16 %v1941_v56 }
  0x90   : > { %409 = vst.msk [vmem:[#allocation2 + $0x21] sm:$0xff] %vm3130_vm0, %v395_v57  ;;  %v387_v63 = vmax.f32 %v1831_v18, %v1948_v58  ;;  %v386_v1 = vmax.f32 %v1830_v17, %v1947_v59  ;;  %v385_v2 = vmax.f32 %v1827_v22, %v1943_v60  ;;  %v635_v59 = vld [vmem:[#allocation2 + $0x49] sm:$0xff] }
  0x91   : > { %407 = vst.msk [vmem:[#allocation2 + $0x11] sm:$0xff] %vm3130_vm0, %v393_v61  ;;  %v384_v3 = vmax.f32 %v1826_v21, %v1942_v62  ;;  %v1951_v4 = vpop.permute.xlu0 %1950  ;;  %v1956_v5 = vpop.permute.xlu1 %1955 }
  0x92   : > { %v397_v7 = vmax.f32 %v386_v1, %v387_v63  ;;  %v1953_v8 = vunpack.i.h.bf16 %v1951_v4  ;;  %v1952_v9 = vunpack.i.l.bf16 %v1951_v4  ;;  %v1958_v10 = vunpack.i.h.bf16 %v1956_v5 }
  0x93   : > { %v396_v11 = vmax.f32 %v384_v3, %v385_v2  ;;  %v1957_v12 = vunpack.i.l.bf16 %v1956_v5  ;;  %v568_v13 = vld [vmem:[#allocation2 + $0x9] sm:$0xff]  ;;  %v570_v21 = vld [vmem:[#allocation2 + $0x19] sm:$0xff] }
  0x94   : > { %411 = vst.msk [vmem:[#allocation2 + $0x31] sm:$0xff] %vm3130_vm0, %v397_v7  ;;  %v389_v14 = vmax.f32 %v1835_v28, %v1953_v8  ;;  %v388_v15 = vmax.f32 %v1834_v26, %v1952_v9  ;;  %v391_v16 = vmax.f32 %v1839_v30, %v1958_v10  ;;  %v1959_v17 = vpack.i.bf16 %v568_v13, %v567_v6  ;;  %v575_v41 = vld [vmem:[#allocation2 + $0x2] sm:$0xff]  ;;  %v2279_v3 = vld [vmem:[%s3122_s1 + $0x10] ss:$0 sps:$4 sm:$0x33]  }
  0x95   : > { %410 = vst.msk [vmem:[#allocation2 + $0x29] sm:$0xff] %vm3130_vm0, %v396_v11  ;;  %v390_v18 = vmax.f32 %v1838_v29, %v1957_v12  ;;  %v2408_v26 = vshrl.u32 %v414_v19, 7  ;;  %v2444_v50 = vld [vmem:[#allocation2 + $0x8] sm:$0xff]  ;;  %1895 = vmatprep.subr.msk.bf16.mxu0 %vm995_vm9, %v2279_v3  ;;  %v3166_v10 = vmov 0 }
  0x96   : > { %v398_v20 = vmax.f32 %v388_v15, %v389_v14  ;;  %1960 = vrot.lane.b32.xlu0 %v1959_v17, %s2297_s8  ;;  %v997_v14 = vsel %vm995_vm9, %v2279_v3, 0  ;;  %v2280_v15 = vld [vmem:[%s3122_s1 + $0x8] sm:$0xff]  }
  0x97   : > { %v399_v22 = vmax.f32 %v390_v18, %v391_v16  ;;  %v571_v27 = vld [vmem:[#allocation2 + $0x21] sm:$0xff]  ;;  %v416_v30 = vadd.s32 8, %v2408_v26  ;;  %v427_v35 = vand.u32 7, %v2408_v26  ;;  %v417_v44 = vadd.s32 16, %v2408_v26  ;;  %1864 = vmatpush3.bf16.msra.mxu0 %v997_v14 }
  0x98   : > { %412 = vst.msk [vmem:[#allocation2 + $0x39] sm:$0xff] %vm3130_vm0, %v398_v20  ;;  %v569_v24 = vld [vmem:[#allocation2 + $0x11] sm:$0xff]  ;;  %v1974_v29 = vpack.i.bf16 %v571_v27, %v570_v21  ;;  %v418_v45 = vadd.s32 24, %v2408_v26  ;;  %v578_v1 = vld [vmem:[#allocation2 + $0x1a] sm:$0xff]  ;;  %v419_v18 = vadd.s32 32, %v2408_v26  ;;  %1865 = vmatprep.subr.bf16.mxu0 %v2280_v15 }
  0x99   : > { %413 = vst.msk [vmem:[#allocation2 + $0x41] sm:$0xff] %vm3130_vm0, %v399_v22  ;;  %v1964_v25 = vpack.i.bf16 %v570_v21, %v569_v24  ;;  %v1969_v23 = vpack.i.bf16 %v569_v24, %v568_v13  ;;  %v434_v36 = vand.u32 7, %v416_v30  ;;  %v576_v39 = vld [vmem:[#allocation2 + $0xa] sm:$0xff]  ;;  %vm2422_vm3 = vcmp.lt.s32.totalorder %v427_v35, 7  ;;  %v577_v53 = vld [vmem:[#allocation2 + $0x12] sm:$0xff]  ;;  %v2497_v12 = vld [vmem:[#allocation2 + $0x20] sm:$0xff] }
  0x9a   : > { %v3157_v40 = vsel %vm2422_vm3, 4294967295, %v3156_v40  ;;  %v2430_v43 = vld [vmem:[#allocation2 + $0x10] sm:$0xff]  ;;  %v599_v46 = vsel %vm2422_vm3, %v575_v41, 0.0  ;;  %vm2436_vm4 = vcmp.gt.s32.totalorder %v427_v35, 0  ;;  %v441_v54 = vand.u32 7, %v417_v44  ;;  %v2472_v2 = vld [vmem:[#allocation2 + $0x18] sm:$0xff] }
  0x9b   : > { %1965 = vrot.lane.b32.xlu1 %v1964_v25, %s2297_s8  ;;  %1970 = vrot.lane.b32.xlu0 %v1969_v23, %s2298_s9  ;;  %v573_v28 = vld [vmem:[#allocation2 + $0x31] sm:$0xff]  ;;  %vm2418_vm2 = vcmp.lt.s32.totalorder %v434_v36, 7  ;;  %v3159_v48 = vsel %vm2436_vm4, 4294967295, %v3158_v48  ;;  %vm2440_vm5 = vcmp.gt.s32.totalorder %v434_v36, 0  ;;  %v448_v55 = vand.u32 7, %v418_v45 }
  0x9c   : > { %v572_v31 = vld [vmem:[#allocation2 + $0x29] sm:$0xff]  ;;  %v600_v42 = vsel %vm2418_vm2, %v576_v39, 0.0  ;;  %v3161_v49 = vsel %vm2440_vm5, 4294967295, %v3160_v49  ;;  %v609_v52 = vsel %vm2440_vm5, %v2430_v43, 0.0  ;;  %v608_v56 = vsel %vm2436_vm4, %v2444_v50, 0.0  ;;  %1866 = vmatpush3.bf16.msra.mxu0 %v2280_v15 }
  0x9d   : > { %v1999_v32 = vpack.i.bf16 %v573_v28, %v572_v31  ;;  %v1984_v34 = vpack.i.bf16 %v572_v31, %v571_v27  ;;  %v2019_v47 = vpack.i.bf16 %v600_v42, %v599_v46  ;;  %v2029_v58 = vpack.i.bf16 %v609_v52, %v608_v56  ;;  %v579_v24 = vld [vmem:[#allocation2 + $0x22] sm:$0xff]  ;;  %v2562_v56 = vld [vmem:[#allocation2 + $0x30] sm:$0xff] }
  0x9e   : > { %v618_v60 = vsel %vm2422_vm3, %v576_v39, 0.0  ;;  %v619_v61 = vsel %vm2418_vm2, %v577_v53, 0.0  ;;  %vm2464_vm7 = vcmp.lt.s32.totalorder %v441_v54, 7  ;;  %vm2468_vm8 = vcmp.lt.s32.totalorder %v448_v55, 7 }
  0x9f   : > { %1975 = vrot.lane.b32.xlu1 %v1974_v29, %s2298_s9  ;;  %1980 = vrot.lane.b32.xlu0 %v1964_v25, %s2299_s10  ;;  %v574_v33 = vld [vmem:[#allocation2 + $0x39] sm:$0xff]  ;;  %v2039_v5 = vpack.i.bf16 %v619_v61, %v618_v60  ;;  %v601_v6 = vsel %vm2464_vm7, %v577_v53, 0.0  ;;  %v602_v7 = vsel %vm2468_vm8, %v578_v1, 0.0  ;;  %v627_v8 = vsel %vm2436_vm4, %v2430_v43, 0.0  ;;  %v580_v25 = vld [vmem:[#allocation2 + $0x2a] sm:$0xff] }
  0xa0   : > { %v2009_v37 = vpack.i.bf16 %v574_v33, %v573_v28  ;;  %v616_v51 = vld [vmem:[#allocation2 + $0x41] sm:$0xff]  ;;  %v628_v9 = vsel %vm2440_vm5, %v2472_v2, 0.0  ;;  %vm2489_vm10 = vcmp.gt.s32.totalorder %v441_v54, 0  ;;  %vm2493_vm11 = vcmp.gt.s32.totalorder %v448_v55, 0  ;;  %v581_v60 = vld [vmem:[#allocation2 + $0x32] sm:$0xff] }
  0xa1   : > { %v2004_v57 = vpack.i.bf16 %v616_v51, %v574_v33  ;;  %v2014_v4 = vpack.i.bf16 %v635_v59, %v616_v51  ;;  %v3167_v10 = vsel %vm2489_vm10, 4294967295, %v3166_v10  ;;  %v420_v13 = vadd.s32 40, %v2408_v26  ;;  %v582_v54 = vld [vmem:[#allocation2 + $0x3a] sm:$0xff] }
  0xa2   : > { %v2024_v16 = vpack.i.bf16 %v602_v7, %v601_v6  ;;  %v2049_v17 = vpack.i.bf16 %v628_v9, %v627_v8  ;;  %v610_v19 = vsel %vm2489_vm10, %v2472_v2, 0.0  ;;  %v611_v20 = vsel %vm2493_vm11, %v2497_v12, 0.0  ;;  %v607_v7 = vld [vmem:[#allocation2 + $0x40] sm:$0xff]  ;;  %v2591_v14 = vld [vmem:[#allocation2 + $0x38] sm:$0xff] }
  0xa3   : > { %1985 = vrot.lane.b32.xlu1 %v1984_v34, %s2299_s10  ;;  %2000 = vrot.lane.b32.xlu0 %v1999_v32, %s2298_s9  ;;  %v637_v21 = vsel %vm2422_vm3, %v577_v53, 0.0  ;;  %v638_v22 = vsel %vm2418_vm2, %v578_v1, 0.0  ;;  %v462_v23 = vand.u32 7, %v420_v13  ;;  %v422_v27 = vadd.s32 56, %v2408_v26  ;;  %v2281_v32 = vld [vmem:[%s3122_s1] sm:$0xff]  }
  0xa4   : > { %v2034_v28 = vpack.i.bf16 %v611_v20, %v610_v19  ;;  %v2059_v29 = vpack.i.bf16 %v638_v22, %v637_v21  ;;  %v455_v30 = vand.u32 7, %v419_v18  ;;  %v421_v31 = vadd.s32 48, %v2408_v26  ;;  %v2529_v26 = vld [vmem:[#allocation2 + $0x28] sm:$0xff]  ;;  %1867 = vmatprep.subr.bf16.mxu0 %v2281_v32 }
  0xa5   : > { %v621_v33 = vsel %vm2468_vm8, %v579_v24, 0.0  ;;  %v640_v35 = vsel %vm2468_vm8, %v580_v25, 0.0  ;;  %v3170_v36 = vmov 0  ;;  %vm2535_vm13 = vcmp.lt.s32.totalorder %v462_v23, 7  ;;  %1868 = vmatpush3.bf16.msra.mxu0 %v2281_v32  ;;  %v617_v19 = vld [vmem:[#allocation2 + $0x42] sm:$0xff] }
  0xa6   : > { %vm2531_vm12 = vcmp.lt.s32.totalorder %v455_v30, 7  ;;  %v476_v39 = vand.u32 7, %v422_v27  ;;  %v620_v41 = vsel %vm2464_vm7, %v578_v1, 0.0  ;;  %v469_v45 = vand.u32 7, %v421_v31  ;;  %v626_v27 = vld [vmem:[#allocation2 + $0x48] sm:$0xff] }
  0xa7   : > { %1990 = vrot.lane.b32.xlu1 %v1984_v34, %s2297_s8  ;;  %2010 = vrot.lane.b32.xlu0 %v2009_v37, %s2299_s10  ;;  %v639_v34 = vsel %vm2464_vm7, %v579_v24, 0.0  ;;  %v3171_v36 = vsel %vm2531_vm12, 4294967295, %v3170_v36  ;;  %v2044_v42 = vpack.i.bf16 %v621_v33, %v620_v41  ;;  %v630_v46 = vsel %vm2493_vm11, %v2529_v26, 0.0 }
  0xa8   : > { %v2064_v44 = vpack.i.bf16 %v640_v35, %v639_v34  ;;  %v604_v51 = vsel %vm2535_vm13, %v580_v25, 0.0  ;;  %vm2550_vm14 = vcmp.lt.s32.totalorder %v469_v45, 7  ;;  %v3174_v52 = vmov 0  ;;  %v636_v34 = vld [vmem:[#allocation2 + $0x4a] sm:$0xff] }
  0xa9   : > { %v3175_v52 = vsel %vm2550_vm14, 4294967295, %v3174_v52  ;;  %vm2554_vm15 = vcmp.lt.s32.totalorder %v476_v39, 7  ;;  %v3176_v53 = vmov 0  ;;  %vm2558_vm1 = vcmp.gt.s32.totalorder %v462_v23, 0 }
  0xaa   : > { %v3177_v53 = vsel %vm2554_vm15, 4294967295, %v3176_v53  ;;  %vm2567_vm9 = vcmp.gt.s32.totalorder %v455_v30, 0  ;;  %v605_v1 = vsel %vm2550_vm14, %v581_v60, 0.0  ;;  %v606_v3 = vsel %vm2554_vm15, %v582_v54, 0.0 }
  0xab   : > { %1995 = vrot.lane.b32.xlu1 %v2009_v37, %s2297_s8  ;;  %2020 = vrot.lane.b32.xlu0 %v2019_v47, %s2300_s11  ;;  %v3172_v37 = vmov 0  ;;  %v603_v47 = vsel %vm2531_vm12, %v579_v24, 0.0  ;;  %vm2583_vm6 = vcmp.gt.s32.totalorder %v476_v39, 0  ;;  %v2074_v8 = vpack.i.bf16 %v606_v3, %v605_v1  ;;  %s2306_s8 = smov 40  }
  0xac   : > { %v3173_v37 = vsel %vm2535_vm13, 4294967295, %v3172_v37  ;;  %v2069_v59 = vpack.i.bf16 %v604_v51, %v603_v47  ;;  %vm2587_vm0 = vcmp.gt.s32.totalorder %v469_v45, 0  ;;  %v623_v18 = vsel %vm2535_vm13, %v581_v60, 0.0 }
  0xad   : > { %v614_v15 = vsel %vm2587_vm0, %v2591_v14, 0.0  ;;  %v624_v22 = vsel %vm2550_vm14, %v582_v54, 0.0  ;;  %v625_v24 = vsel %vm2554_vm15, %v617_v19, 0.0  ;;  %v632_v23 = vsel %vm2558_vm1, %v2591_v14, 0.0 }
  0xae   : > { %v633_v30 = vsel %vm2587_vm0, %v607_v7, 0.0  ;;  %v634_v31 = vsel %vm2583_vm6, %v626_v27, 0.0  ;;  %v641_v32 = vsel %vm2531_vm12, %v581_v60, 0.0  ;;  %v642_v33 = vsel %vm2535_vm13, %v582_v54, 0.0 }
  0xaf   : > { %2005 = vrot.lane.b32.xlu1 %v2004_v57, %s2298_s9  ;;  %2030 = vrot.lane.b32.xlu0 %v2029_v58, %s2301_s12  ;;  %v629_v57 = vsel %vm2489_vm10, %v2497_v12, 0.0  ;;  %v2104_v35 = vpack.i.bf16 %v634_v31, %v633_v30  ;;  %v2109_v39 = vpack.i.bf16 %v642_v33, %v641_v32  ;;  %v643_v41 = vsel %vm2550_vm14, %v617_v19, 0.0 }
  0xb0   : > { %v2054_v58 = vpack.i.bf16 %v630_v46, %v629_v57  ;;  %vm3186_vm13 = vcmask 31744   ;;  %vm3188_vm14 = vcmask 64512  }
  0xb1   : > { %vm3189_vm3 = vmmov %vm3188_vm14 }
  0xb3   : > { %2015 = vrot.lane.b32.xlu1 %v2014_v4, %s2299_s10  ;;  %2040 = vrot.lane.b32.xlu0 %v2039_v5, %s2302_s15  ;;  %v612_v4 = vsel %vm2567_vm9, %v2529_v26, 0.0  ;;  %v613_v5 = vsel %vm2558_vm1, %v2562_v56, 0.0 }
  0xb4   : > { %v2079_v9 = vpack.i.bf16 %v613_v5, %v612_v4  ;;  %v535_v4 = vld [vmem:[#allocation2] sm:$0xff] }
  0xb7   : > { %2025 = vrot.lane.b32.xlu1 %v2024_v16, %s2300_s11  ;;  %2050 = vrot.lane.b32.xlu0 %v2049_v17, %s2303_s18  ;;  %v615_v16 = vsel %vm2583_vm6, %v607_v7, 0.0  ;;  %v622_v17 = vsel %vm2531_vm12, %v580_v25, 0.0  ;;  %v631_v25 = vsel %vm2567_vm9, %v2562_v56, 0.0  ;;  %vm3148_vm12 = vcmask 97280  }
  0xb8   : > { %v2084_v20 = vpack.i.bf16 %v615_v16, %v614_v15  ;;  %v2089_v21 = vpack.i.bf16 %v623_v18, %v622_v17  ;;  %v559_v15 = vsel %vm2436_vm4, %v535_v4, 0.0  ;;  %vm3147_vm4 = vcmask 130048  }
  0xbb   : > { %2035 = vrot.lane.b32.xlu1 %v2034_v28, %s2301_s12  ;;  %2060 = vrot.lane.b32.xlu0 %v2059_v29, %s2304_s21  ;;  %v2094_v28 = vpack.i.bf16 %v625_v24, %v624_v22  ;;  %v2099_v29 = vpack.i.bf16 %v632_v23, %v631_v25 }
  0xbf   : > { %2045 = vrot.lane.b32.xlu1 %v2044_v42, %s2302_s15  ;;  %2065 = vrot.lane.b32.xlu0 %v2064_v44, %s2304_s21  ;;  %v644_v42 = vsel %vm2554_vm15, %v636_v34, 0.0  ;;  %vm3187_vm15 = vmmov %vm3186_vm13 }
  0xc0   : > { %v2114_v44 = vpack.i.bf16 %v644_v42, %v643_v41 }
  0xc3   : > { %2055 = vrot.lane.b32.xlu1 %v2054_v58, %s2303_s18  ;;  %2070 = vrot.lane.b32.xlu0 %v2069_v59, %s2300_s11 }
  0xc7   : > { %2075 = vrot.lane.b32.xlu1 %v2074_v8, %s2300_s11  ;;  %2080 = vrot.lane.b32.xlu0 %v2079_v9, %s2301_s12 }
  0xcb   : > { %2085 = vrot.lane.b32.xlu1 %v2084_v20, %s2301_s12  ;;  %2090 = vrot.lane.b32.xlu0 %v2089_v21, %s2302_s15  ;;  %v560_v20 = vsel %vm2440_vm5, %v2444_v50, 0.0  ;;  %vm3146_vm5 = vcmask 162816  }
  0xcf   : > { %2095 = vrot.lane.b32.xlu1 %v2094_v28, %s2302_s15  ;;  %2100 = vrot.lane.b32.xlu0 %v2099_v29, %s2303_s18 }
  0xd3   : > { %2105 = vrot.lane.b32.xlu1 %v2104_v35, %s2303_s18  ;;  %2110 = vrot.lane.b32.xlu0 %v2109_v39, %s2304_s21 }
  0xd7   : > { %2115 = vrot.lane.b32.xlu1 %v2114_v44, %s2304_s21  ;;  %v561_v44 = vsel %vm2489_vm10, %v2430_v43, 0.0 }
 0x108   : > { %v1961_v45 = vpop.permute.xlu0 %1960 }
 0x109   : > { %v1963_v5 = vunpack.i.h.bf16 %v1961_v45  ;;  %v1962_v7 = vunpack.i.l.bf16 %v1961_v45 }
 0x10b   : > { %v887_v21 = vsel %vm3186_vm13, %v559_v15, %v1962_v7  ;;  %v888_v22 = vsel %vm3187_vm15, %v560_v20, %v1963_v5  ;;  %vm3145_vm13 = vcmask 195584   ;;  %vm3153_vm15 = vcmask 293888  }
 0x10d   : > { %v2633_v46 = vpop.permute.xlu1 %1965  ;;  %v1971_v47 = vpop.permute.xlu0 %1970 }
 0x10e   : > { %v1973_v50 = vunpack.i.h.bf16 %v1971_v47  ;;  %v1972_v32 = vunpack.i.l.bf16 %v1971_v47  ;;  %v1968_v5 = vunpack.i.h.bf16 %v2633_v46  ;;  %v1967_v7 = vunpack.i.l.bf16 %v2633_v46 }
 0x111   : > { %v2635_v51 = vpop.permute.xlu1 %1975  ;;  %v1981_v54 = vpop.permute.xlu0 %1980 }
 0x112   : > { %v1982_v15 = vunpack.i.l.bf16 %v1981_v54 }
 0x115   : > { %v2637_v57 = vpop.permute.xlu1 %1985  ;;  %v2639_v58 = vpop.permute.xlu0 %2000 }
 0x119   : > { %v2641_v59 = vpop.permute.xlu1 %1990  ;;  %v2643_v60 = vpop.permute.xlu0 %2010 }
 0x11d   : > { %v2645_v1 = vpop.permute.xlu1 %1995  ;;  %v2021_v3 = vpop.permute.xlu0 %2020 }
 0x11e   : > { %v2023_v16 = vunpack.i.h.bf16 %v2021_v3  ;;  %v2022_v17 = vunpack.i.l.bf16 %v2021_v3 }
 0x120   : > { %v896_v23 = vsel %vm3188_vm14, %v887_v21, %v2022_v17  ;;  %v897_v27 = vsel %vm3189_vm3, %v888_v22, %v2023_v16  ;;  %vm3149_vm3 = vcmask 228352   ;;  %vm3152_vm14 = vcmask 261120  }
 0x121   : > { %v2647_v8 = vpop.permute.xlu1 %2005  ;;  %v2031_v9 = vpop.permute.xlu0 %2030 }
 0x122   : > { %v2033_v18 = vunpack.i.h.bf16 %v2031_v9  ;;  %v2032_v19 = vunpack.i.l.bf16 %v2031_v9  ;;  %v1983_v9 = vunpack.i.h.bf16 %v1981_v54 }
 0x124   : > { %v905_v28 = vsel %vm3148_vm12, %v896_v23, %v2032_v19  ;;  %v906_v29 = vsel %vm3148_vm12, %v897_v27, %v2033_v18  ;;  %v562_v27 = vsel %vm2493_vm11, %v2472_v2, 0.0 }
 0x125   : > { %v2656_v24 = vpop.permute.xlu1 %2015  ;;  %v2041_v25 = vpop.permute.xlu0 %2040  ;;  %v914_v35 = vsel %vm3147_vm4, %v905_v28, %v1972_v32  ;;  %v915_v39 = vsel %vm3147_vm4, %v906_v29, %v1973_v50  ;;  %vm3192_vm4 = vcmask 64512  }
 0x126   : > { %v2043_v30 = vunpack.i.h.bf16 %v2041_v25  ;;  %v2042_v31 = vunpack.i.l.bf16 %v2041_v25  ;;  %vm3193_vm12 = vmmov %vm3192_vm4 }
 0x128   : > { %v923_v45 = vsel %vm3146_vm5, %v914_v35, %v2042_v31  ;;  %v924_v3 = vsel %vm3146_vm5, %v915_v39, %v2043_v30 }
 0x129   : > { %v2026_v33 = vpop.permute.xlu1 %2025  ;;  %v2051_v34 = vpop.permute.xlu0 %2050 }
 0x12a   : > { %v2053_v41 = vunpack.i.h.bf16 %v2051_v34  ;;  %v2052_v42 = vunpack.i.l.bf16 %v2051_v34  ;;  %v2028_v18 = vunpack.i.h.bf16 %v2026_v33  ;;  %v2027_v43 = vunpack.i.l.bf16 %v2026_v33 }
 0x12c   : > { %v932_v47 = vsel %vm3145_vm13, %v923_v45, %v2052_v42  ;;  %v933_v4 = vsel %vm3145_vm13, %v924_v3, %v2053_v41  ;;  %vm3190_vm13 = vcmask 31744   ;;  %v1978_v41 = vunpack.i.h.bf16 %v2635_v51 }
 0x12d   : > { %v2036_v16 = vpop.permute.xlu1 %2035  ;;  %v2061_v17 = vpop.permute.xlu0 %2060  ;;  %v941_v25 = vsel %vm3149_vm3, %v932_v47, %v1982_v15  ;;  %v942_v23 = vsel %vm3149_vm3, %v933_v4, %v1983_v9  ;;  %v889_v28 = vsel %vm3190_vm13, %v561_v44, %v1967_v7  ;;  %vm3191_vm5 = vmmov %vm3190_vm13  ;;  %vm3194_vm3 = vcmask 97280  }
 0x12e   : > { %v2063_v19 = vunpack.i.h.bf16 %v2061_v17  ;;  %v2062_v20 = vunpack.i.l.bf16 %v2061_v17  ;;  %v2038_v21 = vunpack.i.h.bf16 %v2036_v16  ;;  %v2037_v22 = vunpack.i.l.bf16 %v2036_v16  ;;  %vm3195_vm10 = vmmov %vm3194_vm3 }
 0x12f   : > { %v890_v29 = vsel %vm3191_vm5, %v562_v27, %v1968_v5  ;;  %v898_v32 = vsel %vm3192_vm4, %v889_v28, %v2027_v43  ;;  %v1977_v42 = vunpack.i.l.bf16 %v2635_v51  ;;  %v1988_v44 = vunpack.i.h.bf16 %v2637_v57 }
 0x130   : > { %v950_v46 = vsel %vm3152_vm14, %v941_v25, %v2062_v20  ;;  %v951_v54 = vsel %vm3152_vm14, %v942_v23, %v2063_v19  ;;  %v899_v33 = vsel %vm3193_vm12, %v890_v29, %v2028_v18  ;;  %v907_v34 = vsel %vm3194_vm3, %v898_v32, %v2037_v22 }
 0x131   : > { %v2046_v30 = vpop.permute.xlu1 %2045  ;;  %v2066_v31 = vpop.permute.xlu0 %2065  ;;  %v958_v50 = vpack.c.bf16 %v951_v54, %v950_v46  ;;  %v908_v2 = vsel %vm3195_vm10, %v899_v33, %v2038_v21  ;;  %v1987_v45 = vunpack.i.l.bf16 %v2637_v57  ;;  %v563_v3 = vsel %vm2567_vm9, %v2497_v12, 0.0 }
 0x132   : > { %v2048_v35 = vunpack.i.h.bf16 %v2046_v30  ;;  %v2047_v39 = vunpack.i.l.bf16 %v2046_v30  ;;  %vm3196_vm4 = vcmask 130048   ;;  %v1993_v16 = vunpack.i.h.bf16 %v2641_v59 }
 0x133   : > { %1869 = vmatprep.mubr.msk.bf16.mxu0 %vm3153_vm15, %v958_v50  ;;  %v916_v5 = vsel %vm3196_vm4, %v907_v34, %v1977_v42  ;;  %vm3197_vm5 = vmmov %vm3196_vm4  ;;  %v1992_v51 = vunpack.i.l.bf16 %v2641_v59  ;;  %vm3198_vm10 = vcmask 162816   ;;  %v2068_v18 = vunpack.i.h.bf16 %v2066_v31 }
 0x134   : > { %v917_v7 = vsel %vm3197_vm5, %v908_v2, %v1978_v41  ;;  %v925_v17 = vsel %vm3198_vm10, %v916_v5, %v2047_v39  ;;  %vm3199_vm12 = vmmov %vm3198_vm10  ;;  %vm3200_vm13 = vcmask 195584   ;;  %v2067_v20 = vunpack.i.l.bf16 %v2066_v31 }
 0x135   : > { %v2056_v47 = vpop.permute.xlu1 %2055  ;;  %v2071_v4 = vpop.permute.xlu0 %2070  ;;  %v926_v57 = vsel %vm3199_vm12, %v917_v7, %v2048_v35  ;;  %vm3201_vm3 = vmmov %vm3200_vm13  ;;  %vm3202_vm4 = vcmask 228352   ;;  %v564_v59 = vsel %vm2558_vm1, %v2529_v26, 0.0  ;;  %v565_v46 = vsel %vm2587_vm0, %v2562_v56, 0.0 }
 0x136   : > { %v2058_v9 = vunpack.i.h.bf16 %v2056_v47  ;;  %v2057_v15 = vunpack.i.l.bf16 %v2056_v47  ;;  %v2073_v19 = vunpack.i.h.bf16 %v2071_v4  ;;  %vm3203_vm5 = vmmov %vm3202_vm4  ;;  %v2072_v25 = vunpack.i.l.bf16 %v2071_v4 }
 0x137   : > { %vm3204_vm10 = vcmask 31744   ;;  %v566_v30 = vsel %vm2583_vm6, %v2591_v14, 0.0  ;;  %v1998_v26 = vunpack.i.h.bf16 %v2645_v1  ;;  %v1997_v33 = vunpack.i.l.bf16 %v2645_v1 }
 0x138   : > { %v934_v43 = vsel %vm3200_vm13, %v925_v17, %v2057_v15  ;;  %v935_v12 = vsel %vm3201_vm3, %v926_v57, %v2058_v9  ;;  %v892_v29 = vsel %vm3204_vm10, %v564_v59, %v1993_v16  ;;  %vm3205_vm12 = vmmov %vm3204_vm10  ;;  %vm3206_vm13 = vcmask 64512  }
 0x139   : > { %v943_v21 = vsel %vm3202_vm4, %v934_v43, %v1987_v45  ;;  %v944_v22 = vsel %vm3203_vm5, %v935_v12, %v1988_v44  ;;  %v2076_v23 = vpop.permute.xlu1 %2075  ;;  %v2081_v27 = vpop.permute.xlu0 %2080  ;;  %v891_v32 = vsel %vm3205_vm12, %v563_v3, %v1992_v51  ;;  %v901_v56 = vsel %vm3206_vm13, %v892_v29, %v2073_v19  ;;  %vm3207_vm3 = vmmov %vm3206_vm13 }
 0x13a   : > { %v2083_v54 = vunpack.i.h.bf16 %v2081_v27  ;;  %v2082_v28 = vunpack.i.l.bf16 %v2081_v27  ;;  %v952_v31 = vsel %vm3152_vm14, %v943_v21, %v2067_v20  ;;  %v953_v50 = vsel %vm3152_vm14, %v944_v22, %v2068_v18  ;;  %vm3210_vm12 = vmmov %vm3204_vm10 }
 0x13b   : > { %v900_v34 = vsel %vm3207_vm3, %v891_v32, %v2072_v25  ;;  %v2078_v2 = vunpack.i.h.bf16 %v2076_v23  ;;  %v2077_v35 = vunpack.i.l.bf16 %v2076_v23  ;;  %v959_v42 = vpack.c.bf16 %v953_v50, %v952_v31  ;;  %vm3211_vm13 = vmmov %vm3207_vm3 }
 0x13c   : > { %vm3208_vm4 = vcmask 97280   ;;  %v2003_v3 = vunpack.i.h.bf16 %v2639_v58  ;;  %v2002_v4 = vunpack.i.l.bf16 %v2639_v58  ;;  %v894_v7 = vsel %vm3204_vm10, %v566_v30, %v1998_v26 }
 0x13d   : > { %v2086_v39 = vpop.permute.xlu1 %2085  ;;  %v2091_v41 = vpop.permute.xlu0 %2090  ;;  %v909_v14 = vsel %vm3208_vm4, %v900_v34, %v2082_v28  ;;  %vm3209_vm5 = vmmov %vm3208_vm4  ;;  %1870 = vmatmul.mubr.msk.bf16.vlgmr.msra.gmra.mxu0 %vm3153_vm15, %v959_v42  ;;  %v893_v9 = vsel %vm3210_vm12, %v565_v46, %v1997_v33  ;;  %v2008_v15 = vunpack.i.h.bf16 %v2647_v8  ;;  %v2007_v16 = vunpack.i.l.bf16 %v2647_v8 }
 0x13e   : > { %v910_v44 = vsel %vm3209_vm5, %v901_v56, %v2083_v54  ;;  %v2088_v45 = vunpack.i.h.bf16 %v2086_v39  ;;  %v2087_v47 = vunpack.i.l.bf16 %v2086_v39  ;;  %v2093_v1 = vunpack.i.h.bf16 %v2091_v41 }
 0x13f   : > { %v2092_v5 = vunpack.i.l.bf16 %v2091_v41  ;;  %v903_v51 = vsel %vm3211_vm13, %v894_v7, %v2078_v2  ;;  %v902_v17 = vsel %vm3207_vm3, %v893_v9, %v2077_v35  ;;  %vm3212_vm4 = vcmask 130048  }
 0x140   : > { %v918_v57 = vsel %vm3212_vm4, %v909_v14, %v2002_v4  ;;  %vm3213_vm5 = vmmov %vm3212_vm4  ;;  %vm3214_vm14 = vcmask 97280   ;;  %vm3216_vm10 = vcmask 162816   ;;  %vm3218_vm13 = vcmask 195584  }
 0x141   : > { %v919_v58 = vsel %vm3213_vm5, %v910_v44, %v2003_v3  ;;  %v2096_v18 = vpop.permute.xlu1 %2095  ;;  %v2101_v43 = vpop.permute.xlu0 %2100  ;;  %v911_v12 = vsel %vm3214_vm14, %v902_v17, %v2087_v47  ;;  %vm3215_vm15 = vmmov %vm3214_vm14  ;;  %v927_v22 = vsel %vm3216_vm10, %v918_v57, %v2092_v5  ;;  %v2013_v46 = vunpack.i.h.bf16 %v2643_v60 }
 0x142   : > { %v912_v19 = vsel %vm3215_vm15, %v903_v51, %v2088_v45  ;;  %v2103_v20 = vunpack.i.h.bf16 %v2101_v43  ;;  %v2102_v21 = vunpack.i.l.bf16 %v2101_v43  ;;  %vm3217_vm12 = vmmov %vm3216_vm10  ;;  %v2098_v25 = vunpack.i.h.bf16 %v2096_v18  ;;  %v1776_v51 = vld [vmem:[%s3124_s3] ss:$0 sm:$0xff] }
 0x143   : > { %v928_v8 = vsel %vm3217_vm12, %v919_v58, %v2093_v1  ;;  %v2097_v23 = vunpack.i.l.bf16 %v2096_v18  ;;  %vm3219_vm3 = vmmov %vm3218_vm13  ;;  %v2012_v54 = vunpack.i.l.bf16 %v2643_v60  ;;  %v920_v28 = vsel %vm3212_vm4, %v911_v12, %v2007_v16 }
 0x144   : > { %v936_v27 = vsel %vm3218_vm13, %v927_v22, %v2102_v21  ;;  %v937_v59 = vsel %vm3219_vm3, %v928_v8, %v2103_v20  ;;  %vm3220_vm14 = vmmov %vm3212_vm4  ;;  %vm3226_vm4 = vcmask 261120   ;;  %v2018_v14 = vunpack.i.h.bf16 %v2656_v24 }
 0x145   : > { %v921_v29 = vsel %vm3220_vm14, %v912_v19, %v2008_v15  ;;  %v2106_v30 = vpop.permute.xlu1 %2105  ;;  %v2111_v31 = vpop.permute.xlu0 %2110  ;;  %vm3221_vm15 = vmmov %vm3216_vm10  ;;  %v2017_v44 = vunpack.i.l.bf16 %v2656_v24  ;;  %v1775_v24 = vld [vmem:[%s3123_s2] ss:$0 sm:$0xff] }
 0x146   : > { %v2108_v50 = vunpack.i.h.bf16 %v2106_v30  ;;  %v2107_v32 = vunpack.i.l.bf16 %v2106_v30  ;;  %v2113_v26 = vunpack.i.h.bf16 %v2111_v31  ;;  %v2112_v33 = vunpack.i.l.bf16 %v2111_v31  ;;  %vm3222_vm5 = vmmov %vm3216_vm10 }
 0x147   : > { %v929_v56 = vsel %vm3221_vm15, %v920_v28, %v2097_v23  ;;  %v930_v34 = vsel %vm3222_vm5, %v921_v29, %v2098_v25  ;;  %vm3223_vm10 = vcmask 228352   ;;  %vm3225_vm13 = vmmov %vm3219_vm3 }
 0x148   : > { %v945_v2 = vsel %vm3223_vm10, %v936_v27, %v2012_v54  ;;  %vm3224_vm12 = vmmov %vm3223_vm10  ;;  %v938_v60 = vsel %vm3225_vm13, %v929_v56, %v2107_v32  ;;  %v939_v39 = vsel %vm3219_vm3, %v930_v34, %v2108_v50 }
 0x149   : > { %v946_v35 = vsel %vm3224_vm12, %v937_v59, %v2013_v46  ;;  %v954_v41 = vsel %vm3226_vm4, %v945_v2, %v2112_v33  ;;  %vm3227_vm14 = vmmov %vm3226_vm4  ;;  %v2116_v47 = vpop.permute.xlu1 %2115 }
 0x14a   : > { %v955_v42 = vsel %vm3227_vm14, %v946_v35, %v2113_v26  ;;  %v2118_v3 = vunpack.i.h.bf16 %v2116_v47  ;;  %v2117_v4 = vunpack.i.l.bf16 %v2116_v47  ;;  %vm3228_vm15 = vmmov %vm3223_vm10  ;;  %vm3234_vm14 = vcmask 64512  }
 0x14b   : > { %v960_v45 = vpack.c.bf16 %v955_v42, %v954_v41  ;;  %v947_v1 = vsel %vm3228_vm15, %v938_v60, %v2017_v44  ;;  %vm3229_vm5 = vmmov %vm3223_vm10  ;;  %vm3230_vm10 = vcmask 293888  }
 0x14c   : > { %v948_v5 = vsel %vm3229_vm5, %v939_v39, %v2018_v14  ;;  %vm3231_vm12 = vmmov %vm3226_vm4 }
 0x14d   : > { %1873 = vmatprep.mubr.msk.bf16.mxu0 %vm3230_vm10, %v960_v45  ;;  %v956_v7 = vsel %vm3231_vm12, %v947_v1, %v2117_v4  ;;  %vm3232_vm13 = vmmov %vm3226_vm4  ;;  %vm1103_vm4 = vcmask 57344  }
 0x14e   : > { %v957_v9 = vsel %vm3232_vm13, %v948_v5, %v2118_v3  ;;  %vm3233_vm3 = vmmov %vm3230_vm10  ;;  %1104 = vst.msk [vmem:[#allocation3 + $0x8] sm:$0x1] %vm1103_vm4, %v2295_v0 }
 0x14f   : > { %v961_v15 = vpack.c.bf16 %v957_v9, %v956_v7  ;;  %1106 = vst.msk [vmem:[#allocation3 + $0x51] sm:$0x1] %vm1103_vm4, %v2295_v0  ;;  %vm3235_vm15 = vmmov %vm3234_vm14  ;;  %vm3241_vm4 = vnez %v3157_v40  ;;  %v2284_v40 = vld [vmem:[%s3125_s4 + $0x10] sm:$0xff]  }
 0x150   : > { %vm3236_vm5 = vmmov %vm3234_vm14 }
 0x151   : > { %1874 = vmatmul.mubr.msk.bf16.gmra.mxu0 %vm3233_vm3, %v961_v15  ;;  %vm3237_vm10 = vmmov %vm3236_vm5 }
 0x152   : > { %vm3238_vm12 = vmmov %vm3236_vm5 }
 0x153   : > { %vm3239_vm13 = vmmov %vm3236_vm5 }
 0x154   : > { %vm3240_vm3 = vmmov %vm3236_vm5 }
 0x155   : > { %v1131_v59 = vld [vmem:[#allocation3 + $0x1] sm:$0xff] }
 0x1fd   : > { %v1871_v16 = vpop.f32.mrf.mxu0 }
 0x1fe   : > { %v1073_v17 = vmul.f32 %v1871_v16, %v1775_v24 }
 0x1ff   : > { %v1033_v57 = vpop.f32.mrf.mxu0 }
 0x200   : > { %v1088_v58 = vadd.f32 %v1776_v51, %v1073_v17  ;;  %v1071_v18 = vmul.f32 %v1775_v24, %v1033_v57 }
 0x201   : > { %v1872_v43 = vpop.f32.mrf.mxu0 }
 0x202   : > { %v1096_v12 = vmax.f32 %v1088_v58, 0.0  ;;  %v1086_v19 = vadd.f32 %v1776_v51, %v1071_v18  ;;  %v1074_v20 = vmul.f32 %v1872_v43, %v1775_v24 }
 0x203   : > { %v1036_v21 = vpop.f32.mrf.mxu0 }
 0x204   : > { %1109 = vst.msk [vmem:[#allocation3 + $0x19] sm:$0xff] %vm3234_vm14, %v1096_v12  ;;  %v1094_v0 = vmax.f32 %v1086_v19, 0.0  ;;  %v1089_v22 = vadd.f32 %v1776_v51, %v1074_v20  ;;  %v1072_v8 = vmul.f32 %v1775_v24, %v1036_v21  ;;  %vm3242_vm14 = vnez %v3167_v10 }
 0x206   : > { %1107 = vst.msk [vmem:[#allocation3 + $0x9] sm:$0xff] %vm3235_vm15, %v1094_v0  ;;  %v1097_v25 = vmax.f32 %v1089_v22, 0.0  ;;  %v1087_v23 = vadd.f32 %v1776_v51, %v1072_v8  ;;  %vm3243_vm15 = vmmov %vm3240_vm3 }
 0x208   : > { %1110 = vst.msk [vmem:[#allocation3 + $0x21] sm:$0xff] %vm3236_vm5, %v1097_v25  ;;  %v1095_v27 = vmax.f32 %v1087_v23, 0.0  ;;  %vm3244_vm5 = vnez %v3161_v49 }
 0x20a   : > { %1108 = vst.msk [vmem:[#allocation3 + $0x11] sm:$0xff] %vm3237_vm10, %v1095_v27  ;;  %vm3245_vm10 = vnez %v3159_v48  ;;  %v2282_v27 = vld [vmem:[%s3125_s4 + $0x20] ss:$0 sps:$4 sm:$0xff]  }
 0x20b   : > { %v1134_v31 = vld [vmem:[#allocation3 + $0x19] sm:$0xff] }
 0x20d   : > { %v1132_v54 = vld [vmem:[#allocation3 + $0x9] sm:$0xff] }
 0x20e   : > { %v2119_v29 = vpack.i.bf16 %v1132_v54, %v1131_v59  ;;  %v1139_v9 = vld [vmem:[#allocation3 + $0x2] sm:$0xff] }
 0x20f   : > { %v1135_v50 = vld [vmem:[#allocation3 + $0x21] sm:$0xff]  ;;  %v1147_v18 = vsel %vm3241_vm4, %v1139_v9, 0.0 }
 0x210   : > { %2120 = vrot.lane.b32.xlu0 %v2119_v29, %s2300_s11  ;;  %v2124_v33 = vpack.i.bf16 %v1135_v50, %v1134_v31  ;;  %v1142_v3 = vld [vmem:[#allocation3 + $0x1a] sm:$0xff]  ;;  %v2802_v19 = vld [vmem:[#allocation3 + $0x8] sm:$0xff] }
 0x211   : > { %v1875_v46 = vpop.f32.mrf.mxu0  ;;  %v1133_v34 = vld [vmem:[#allocation3 + $0x11] sm:$0xff]  ;;  %v1150_v16 = vsel %vm2468_vm8, %v1142_v3, 0.0  ;;  %v2791_v58 = vld [vmem:[#allocation3 + $0x20] sm:$0xff]  ;;  %v1156_v22 = vsel %vm3245_vm10, %v2802_v19, 0.0 }
 0x212   : > { %v1077_v28 = vmul.f32 %v1875_v46, %v1775_v24  ;;  %2125 = vrot.lane.b32.xlu1 %v2124_v33, %s2304_s21  ;;  %v2134_v39 = vpack.i.bf16 %v1133_v34, %v1132_v54  ;;  %v2774_v41 = vld [vmem:[#allocation3 + $0x12] sm:$0xff]  ;;  %v2129_v47 = vpack.i.bf16 %v1134_v31, %v1133_v34  ;;  %v1140_v4 = vld [vmem:[#allocation3 + $0xa] sm:$0xff]  ;;  %v1159_v20 = vsel %vm2493_vm11, %v2791_v58, 0.0 }
 0x213   : > { %v1049_v30 = vpop.f32.mrf.mxu0  ;;  %v1149_v1 = vsel %vm2464_vm7, %v2774_v41, 0.0  ;;  %v2783_v15 = vld [vmem:[#allocation3 + $0x18] sm:$0xff]  ;;  %v1166_v59 = vsel %vm3241_vm4, %v1140_v4, 0.0  ;;  %v1167_v46 = vsel %vm2418_vm2, %v2774_v41, 0.0  ;;  %v1168_v33 = vsel %vm2464_vm7, %v1142_v3, 0.0 }
 0x214   : > { %v1092_v32 = vadd.f32 %v1776_v51, %v1077_v28  ;;  %v1075_v26 = vmul.f32 %v1775_v24, %v1049_v30  ;;  %2135 = vrot.lane.b32.xlu0 %v2134_v39, %s2304_s21  ;;  %v2149_v57 = vpack.i.bf16 %v1150_v16, %v1149_v1  ;;  %v1158_v43 = vsel %vm3242_vm14, %v2783_v15, 0.0 }
 0x215   : > { %v1876_v56 = vpop.f32.mrf.mxu0  ;;  %v2159_v0 = vpack.i.bf16 %v1159_v20, %v1158_v43  ;;  %v2164_v54 = vpack.i.bf16 %v1167_v46, %v1166_v59  ;;  %v1176_v30 = vsel %vm3244_vm5, %v2783_v15, 0.0 }
 0x216   : > { %v1100_v2 = vmax.f32 %v1092_v32, 0.0  ;;  %v1090_v35 = vadd.f32 %v1776_v51, %v1075_v26  ;;  %v1078_v60 = vmul.f32 %v1876_v56, %v1775_v24  ;;  %2130 = vrot.lane.b32.xlu1 %v2129_v47, %s2300_s11  ;;  %v2283_v26 = vld [vmem:[%s3125_s4 + $0x18] sm:$0xff]   ;;  %v1185_v56 = vsel %vm3241_vm4, %v2774_v41, 0.0  ;;  %vm3250_vm4 = vmmov %vm3240_vm3 }
 0x217   : > { %v1052_v42 = vpop.f32.mrf.mxu0  ;;  %v1177_v41 = vsel %vm3242_vm14, %v2791_v58, 0.0 }
 0x218   : > { %1113 = vst.msk [vmem:[#allocation3 + $0x39] sm:$0xff] %vm3238_vm12, %v1100_v2  ;;  %v1098_v14 = vmax.f32 %v1090_v35, 0.0  ;;  %v1093_v44 = vadd.f32 %v1776_v51, %v1078_v60  ;;  %v1076_v45 = vmul.f32 %v1775_v24, %v1052_v42  ;;  %v1148_v24 = vsel %vm2418_vm2, %v1140_v4, 0.0  ;;  %2140 = vrot.lane.b32.xlu0 %v2129_v47, %s2305_s28 }
 0x219   : > { %v2144_v12 = vpack.i.bf16 %v1148_v24, %v1147_v18  ;;  %vm1556_vm12 = vcmask 1043456   ;;  %v1186_v35 = vsel %vm2418_vm2, %v1142_v3, 0.0  ;;  %v2285_v3 = vld [vmem:[%s3125_s4 + $0x8] sm:$0xff]   ;;  %vm3246_vm2 = vnez %v3175_v52 }
 0x21a   : > { %1111 = vst.msk [vmem:[#allocation3 + $0x29] sm:$0xff] %vm3239_vm13, %v1098_v14  ;;  %v1101_v5 = vmax.f32 %v1093_v44, 0.0  ;;  %v1091_v7 = vadd.f32 %v1776_v51, %v1076_v45  ;;  %v2793_v51 = vld [vmem:[#allocation3 + $0x10] sm:$0xff]  ;;  %2150 = vrot.lane.b32.xlu1 %v2149_v57, %s2298_s9  ;;  %1896 = vmatprep.subr.msk.bf16.mxu1 %vm1556_vm12, %v2282_v27  ;;  %v1558_v2 = vsel %vm1556_vm12, %v2282_v27, 0  ;;  %v2174_v39 = vpack.i.bf16 %v1186_v35, %v1185_v56  ;;  %v2286_v57 = vld [vmem:[%s3125_s4] sm:$0xff]  }
 0x21b   : > { %v1157_v21 = vsel %vm3244_vm5, %v2793_v51, 0.0  ;;  %v1175_v29 = vsel %vm3245_vm10, %v2793_v51, 0.0  ;;  %1878 = vmatpush3.bf16.msra.mxu1 %v1558_v2  ;;  %vm3247_vm13 = vnez %v3177_v53  ;;  %v1115_v53 = vld [vmem:[#allocation3] sm:$0xff] }
 0x21c   : > { %1114 = vst.msk [vmem:[#allocation3 + $0x41] sm:$0xff] %vm3240_vm3, %v1101_v5  ;;  %v1099_v17 = vmax.f32 %v1091_v7, 0.0  ;;  %2145 = vrot.lane.b32.xlu0 %v2144_v12, %s2298_s9  ;;  %v2154_v25 = vpack.i.bf16 %v1157_v21, %v1156_v22  ;;  %1879 = vmatprep.subr.bf16.mxu1 %v2283_v26 }
 0x21e   : > { %1112 = vst.msk [vmem:[#allocation3 + $0x31] sm:$0xff] %vm3243_vm15, %v1099_v17  ;;  %2160 = vrot.lane.b32.xlu1 %v2159_v0, %s2303_s18  ;;  %vm3251_vm15 = vcmask 130048  }
 0x21f   : > { %1880 = vmatpush3.bf16.msra.mxu1 %v2283_v26  ;;  %v1138_v4 = vld [vmem:[#allocation3 + $0x39] sm:$0xff]  ;;  %vm3252_vm12 = vmmov %vm3251_vm15 }
 0x220   : > { %2155 = vrot.lane.b32.xlu0 %v2154_v25, %s2303_s18  ;;  %1881 = vmatprep.subr.bf16.mxu1 %v2284_v40 }
 0x221   : > { %v1136_v8 = vld [vmem:[#allocation3 + $0x29] sm:$0xff] }
 0x222   : > { %v2179_v23 = vpack.i.bf16 %v1136_v8, %v1135_v50  ;;  %v2826_v28 = vld [vmem:[#allocation3 + $0x22] sm:$0xff]  ;;  %v2169_v50 = vpack.i.bf16 %v1176_v30, %v1175_v29 }
 0x223   : > { %v1169_v31 = vsel %vm2468_vm8, %v2826_v28, 0.0  ;;  %v2839_v32 = vld [vmem:[#allocation3 + $0x28] sm:$0xff]  ;;  %v2867_v45 = vld [vmem:[#allocation3 + $0x3a] sm:$0xff]  ;;  %1882 = vmatpush3.bf16.msra.mxu1 %v2284_v40  ;;  %v1187_v12 = vsel %vm2464_vm7, %v2826_v28, 0.0  ;;  %vm3249_vm7 = vnez %v3171_v36 }
 0x224   : > { %2180 = vrot.lane.b32.xlu1 %v2179_v23, %s2305_s28  ;;  %2165 = vrot.lane.b32.xlu0 %v2164_v54, %s2306_s8  ;;  %v2189_v34 = vpack.i.bf16 %v1169_v31, %v1168_v33  ;;  %v1178_v60 = vsel %vm2493_vm11, %v2839_v32, 0.0  ;;  %v2864_v14 = vld [vmem:[#allocation3 + $0x41] sm:$0xff]  ;;  %v1172_v7 = vsel %vm3246_vm2, %v2867_v45, 0.0  ;;  %v1151_v62 = vsel %vm3249_vm7, %v2826_v28, 0.0  ;;  %v1184_v40 = vld [vmem:[#allocation3 + $0x4a] sm:$0xff] }
 0x225   : > { %v1137_v42 = vld [vmem:[#allocation3 + $0x31] sm:$0xff]  ;;  %v2194_v38 = vpack.i.bf16 %v1178_v60, %v1177_v41  ;;  %v2869_v47 = vld [vmem:[#allocation3 + $0x42] sm:$0xff]  ;;  %v2199_v1 = vpack.i.bf16 %v2864_v14, %v1138_v4  ;;  %1883 = vmatprep.subr.bf16.mxu1 %v2285_v3  ;;  %v1160_v59 = vsel %vm2567_vm9, %v2839_v32, 0.0  ;;  %v1154_v29 = vsel %vm3247_vm13, %v2867_v45, 0.0 }
 0x226   : > { %v2219_v44 = vpack.i.bf16 %v1137_v42, %v1136_v8  ;;  %v1144_v5 = vld [vmem:[#allocation3 + $0x2a] sm:$0xff]  ;;  %v1173_v9 = vsel %vm3247_vm13, %v2869_v47, 0.0  ;;  %v2224_v16 = vpack.i.bf16 %v1138_v4, %v1137_v42  ;;  %v1155_v24 = vld [vmem:[#allocation3 + $0x40] sm:$0xff]  ;;  %v2916_v28 = vld [vmem:[#allocation3 + $0x38] sm:$0xff] }
 0x227   : > { %v1174_v17 = vld [vmem:[#allocation3 + $0x48] sm:$0xff]  ;;  %v1188_v18 = vsel %vm2468_vm8, %v1144_v5, 0.0  ;;  %v2204_v43 = vpack.i.bf16 %v1173_v9, %v1172_v7  ;;  %v1181_v20 = vsel %vm2587_vm0, %v1155_v24, 0.0  ;;  %1884 = vmatpush3.bf16.msra.mxu1 %v2285_v3  ;;  %vm3248_vm8 = vnez %v3173_v37  ;;  %v2900_v8 = vld [vmem:[#allocation3 + $0x30] sm:$0xff] }
 0x228   : > { %2185 = vrot.lane.b32.xlu1 %v2179_v23, %s2300_s11  ;;  %2170 = vrot.lane.b32.xlu0 %v2169_v50, %s2307_s13  ;;  %v1182_v21 = vsel %vm2583_vm6, %v1174_v17, 0.0  ;;  %v2229_v0 = vpack.i.bf16 %v1188_v18, %v1187_v12  ;;  %v1152_v63 = vsel %vm3248_vm8, %v1144_v5, 0.0  ;;  %v1145_v23 = vld [vmem:[#allocation3 + $0x32] sm:$0xff]  ;;  %v1161_v27 = vsel %vm2558_vm1, %v2900_v8, 0.0  ;;  %v1183_v60 = vld [vmem:[#allocation3 + $0x49] sm:$0xff] }
 0x229   : > { %1885 = vmatprep.subr.bf16.mxu1 %v2286_v57  ;;  %v2209_v22 = vpack.i.bf16 %v1182_v21, %v1181_v20  ;;  %v2234_v25 = vpack.i.bf16 %v1152_v63, %v1151_v62  ;;  %v1153_v46 = vsel %vm3246_vm2, %v1145_v23, 0.0  ;;  %v2244_v54 = vpack.i.bf16 %v1161_v27, %v1160_v59 }
 0x22a   : > { %v1170_v30 = vsel %vm3249_vm7, %v1144_v5, 0.0  ;;  %v1171_v31 = vsel %vm3248_vm8, %v1145_v23, 0.0  ;;  %v2239_v50 = vpack.i.bf16 %v1154_v29, %v1153_v46  ;;  %v1162_v26 = vsel %vm2587_vm0, %v2916_v28, 0.0 }
 0x22b   : > { %1886 = vmatpush3.bf16.msra.mxu1 %v2286_v57  ;;  %v2259_v33 = vpack.i.bf16 %v1171_v31, %v1170_v30  ;;  %v1163_v56 = vsel %vm2583_vm6, %v1155_v24, 0.0  ;;  %v1180_v2 = vsel %vm2558_vm1, %v2916_v28, 0.0  ;;  %v1189_v41 = vsel %vm3249_vm7, %v1145_v23, 0.0 }
 0x22c   : > { %2190 = vrot.lane.b32.xlu1 %v2189_v34, %s2306_s8  ;;  %2175 = vrot.lane.b32.xlu0 %v2174_v39, %s2308_s16  ;;  %v1179_v34 = vsel %vm2567_vm9, %v2900_v8, 0.0  ;;  %v2249_v35 = vpack.i.bf16 %v1163_v56, %v1162_v26  ;;  %v2254_v42 = vpack.i.bf16 %v1183_v60, %v2864_v14  ;;  %v1192_v3 = vsel %vm3247_vm13, %v1184_v40, 0.0 }
 0x22d   : > { %v2264_v39 = vpack.i.bf16 %v1180_v2, %v1179_v34  ;;  %v1123_v17 = vsel %vm3245_vm10, %v1115_v53, 0.0  ;;  %v1124_v21 = vsel %vm3244_vm5, %v2802_v19, 0.0  ;;  %vm3253_vm10 = vcmask 195584  }
 0x22e   : > { %vm1467_vm5 = vcmask 326656   ;;  %vm1476_vm13 = vcmask 392192   ;;  %v1125_v26 = vsel %vm3242_vm14, %v2793_v51, 0.0  ;;  %vm1543_vm14 = vcmask 588800  }
 0x230   : > { %2195 = vrot.lane.b32.xlu1 %v2194_v38, %s2307_s13  ;;  %2220 = vrot.lane.b32.xlu0 %v2219_v44, %s2304_s21  ;;  %v1190_v38 = vsel %vm3248_vm8, %v2867_v45, 0.0  ;;  %v1191_v44 = vsel %vm3246_vm2, %v2869_v47, 0.0  ;;  %vm3254_vm2 = vmmov %vm3253_vm10  ;;  %vm3255_vm8 = vcmask 261120  }
 0x231   : > { %v2269_v4 = vpack.i.bf16 %v1190_v38, %v1189_v41  ;;  %v2274_v36 = vpack.i.bf16 %v1192_v3, %v1191_v44  ;;  %vm3256_vm7 = vmmov %vm3255_vm8 }
 0x234   : > { %2200 = vrot.lane.b32.xlu1 %v2199_v1, %s2304_s21  ;;  %2225 = vrot.lane.b32.xlu0 %v2224_v16, %s2305_s28 }
 0x238   : > { %2205 = vrot.lane.b32.xlu1 %v2204_v43, %s2306_s8  ;;  %2230 = vrot.lane.b32.xlu0 %v2229_v0, %s2308_s16 }
 0x23c   : > { %2210 = vrot.lane.b32.xlu1 %v2209_v22, %s2307_s13  ;;  %2235 = vrot.lane.b32.xlu0 %v2234_v25, %s2298_s9 }
 0x240   : > { %2215 = vrot.lane.b32.xlu1 %v2224_v16, %s2300_s11  ;;  %2245 = vrot.lane.b32.xlu0 %v2244_v54, %s2303_s18 }
 0x244   : > { %2240 = vrot.lane.b32.xlu1 %v2239_v50, %s2298_s9  ;;  %2260 = vrot.lane.b32.xlu0 %v2259_v33, %s2306_s8 }
 0x248   : > { %2250 = vrot.lane.b32.xlu1 %v2249_v35, %s2303_s18  ;;  %2265 = vrot.lane.b32.xlu0 %v2264_v39, %s2307_s13 }
 0x24c   : > { %2255 = vrot.lane.b32.xlu1 %v2254_v42, %s2305_s28  ;;  %2270 = vrot.lane.b32.xlu0 %v2269_v4, %s2308_s16  ;;  %s3100_s28 = scalar_lea.vmem %s3128_s7, %s1799_s23 }
 0x250   : > { %2275 = vrot.lane.b32.xlu1 %v2274_v36, %s2308_s16 }
 0x282   : > { %v2121_v14 = vpop.permute.xlu0 %2120 }
 0x283   : > { %v2123_v9 = vunpack.i.h.bf16 %v2121_v14  ;;  %v2122_v16 = vunpack.i.l.bf16 %v2121_v14 }
 0x284   : > { %v2955_v1 = vpop.permute.xlu1 %2125 }
 0x285   : > { %v1435_v0 = vsel %vm3240_vm3, %v1123_v17, %v2122_v16  ;;  %v1436_v63 = vsel %vm3250_vm4, %v1124_v21, %v2123_v9  ;;  %vm1485_vm3 = vcmask 457728   ;;  %vm1494_vm4 = vcmask 523264  }
 0x286   : > { %v2136_v37 = vpop.permute.xlu0 %2135 }
 0x287   : > { %v2138_v54 = vunpack.i.h.bf16 %v2136_v37  ;;  %v2137_v49 = vunpack.i.l.bf16 %v2136_v37 }
 0x288   : > { %v2957_v45 = vpop.permute.xlu1 %2130 }
 0x289   : > { %v2133_v60 = vunpack.i.h.bf16 %v2957_v45  ;;  %v2132_v39 = vunpack.i.l.bf16 %v2957_v45  ;;  %v1126_v45 = vsel %vm2493_vm11, %v2783_v15, 0.0  ;;  %vm3263_vm11 = vcmask 261120  }
 0x28a   : > { %v2141_v5 = vpop.permute.xlu0 %2140 }
 0x28b   : > { %v2143_v40 = vunpack.i.h.bf16 %v2141_v5  ;;  %v2142_v41 = vunpack.i.l.bf16 %v2141_v5 }
 0x28c   : > { %v2959_v52 = vpop.permute.xlu1 %2150 }
 0x28d   : > { %v2153_v10 = vunpack.i.h.bf16 %v2959_v52  ;;  %v2152_v51 = vunpack.i.l.bf16 %v2959_v52 }
 0x28e   : > { %v2146_v47 = vpop.permute.xlu0 %2145 }
 0x28f   : > { %v2148_v57 = vunpack.i.h.bf16 %v2146_v47  ;;  %v2147_v18 = vunpack.i.l.bf16 %v2146_v47 }
 0x290   : > { %v2961_v7 = vpop.permute.xlu1 %2160 }
 0x291   : > { %v1444_v62 = vsel %vm3251_vm15, %v1436_v63, %v2148_v57  ;;  %v1443_v48 = vsel %vm3252_vm12, %v1435_v0, %v2147_v18  ;;  %v2163_v3 = vunpack.i.h.bf16 %v2961_v7  ;;  %v2162_v4 = vunpack.i.l.bf16 %v2961_v7 }
 0x292   : > { %v2156_v24 = vpop.permute.xlu0 %2155  ;;  %vm3257_vm15 = vcmask 64512  }
 0x293   : > { %v2158_v43 = vunpack.i.h.bf16 %v2156_v24  ;;  %v2157_v12 = vunpack.i.l.bf16 %v2156_v24  ;;  %v1437_v52 = vsel %vm3257_vm15, %v1125_v26, %v2132_v39  ;;  %vm3258_vm12 = vmmov %vm3257_vm15  ;;  %v1128_v39 = vsel %vm2558_vm1, %v2839_v32, 0.0 }
 0x294   : > { %v1438_v53 = vsel %vm3258_vm12, %v1126_v45, %v2133_v60  ;;  %vm3264_vm15 = vmmov %vm3263_vm11  ;;  %v1127_v60 = vsel %vm2567_vm9, %v2791_v58, 0.0 }
 0x295   : > { %v1452_v25 = vsel %vm3253_vm10, %v1444_v62, %v2158_v43  ;;  %v1451_v23 = vsel %vm3254_vm2, %v1443_v48, %v2157_v12  ;;  %vm3259_vm10 = vcmask 130048   ;;  %v2128_v43 = vunpack.i.h.bf16 %v2955_v1  ;;  %vm3265_vm9 = vmmov %vm3258_vm12 }
 0x296   : > { %v2965_v20 = vpop.permute.xlu1 %2180  ;;  %v2166_v22 = vpop.permute.xlu0 %2165  ;;  %v1459_v29 = vsel %vm3255_vm8, %v1451_v23, %v2137_v49  ;;  %v1460_v30 = vsel %vm3256_vm7, %v1452_v25, %v2138_v54  ;;  %v1445_v16 = vsel %vm3259_vm10, %v1437_v52, %v2152_v51  ;;  %vm3260_vm2 = vmmov %vm3259_vm10  ;;  %vm3261_vm8 = vcmask 195584  }
 0x297   : > { %v2168_v27 = vunpack.i.h.bf16 %v2166_v22  ;;  %v2167_v59 = vunpack.i.l.bf16 %v2166_v22  ;;  %v1446_v24 = vsel %vm3260_vm2, %v1438_v53, %v2153_v10  ;;  %v1453_v17 = vsel %vm3261_vm8, %v1445_v16, %v2162_v4  ;;  %vm3262_vm7 = vmmov %vm3261_vm8 }
 0x298   : > { %v1454_v11 = vsel %vm3262_vm7, %v1446_v24, %v2163_v3  ;;  %v2127_v12 = vunpack.i.l.bf16 %v2955_v1  ;;  %v2183_v1 = vunpack.i.h.bf16 %v2965_v20  ;;  %v2182_v54 = vunpack.i.l.bf16 %v2965_v20  ;;  %vm3268_vm1 = vmmov %vm3262_vm7 }
 0x299   : > { %v1468_v33 = vsel %vm1467_vm5, %v1459_v29, %v2167_v59  ;;  %v1469_v56 = vsel %vm1467_vm5, %v1460_v30, %v2168_v27  ;;  %v1462_v62 = vsel %vm3264_vm15, %v1454_v11, %v2128_v43  ;;  %v1129_v10 = vsel %vm2587_vm0, %v2900_v8, 0.0  ;;  %vm3266_vm0 = vmmov %vm3260_vm2 }
 0x29a   : > { %v2976_v46 = vpop.permute.xlu1 %2185  ;;  %v2171_v19 = vpop.permute.xlu0 %2170  ;;  %v1461_v22 = vsel %vm3263_vm11, %v1453_v17, %v2127_v12  ;;  %vm3269_vm10 = vmmov %vm3268_vm1 }
 0x29b   : > { %v2173_v31 = vunpack.i.h.bf16 %v2171_v19  ;;  %v2172_v50 = vunpack.i.l.bf16 %v2171_v19  ;;  %vm3270_vm2 = vmmov %vm3265_vm9 }
 0x29c   : > { %vm3271_vm8 = vmmov %vm3270_vm2 }
 0x29d   : > { %v1477_v2 = vsel %vm1476_vm13, %v1468_v33, %v2172_v50  ;;  %v1478_v35 = vsel %vm1476_vm13, %v1469_v56, %v2173_v31  ;;  %vm3272_vm7 = vmmov %vm3266_vm0 }
 0x29e   : > { %v2191_v34 = vpop.permute.xlu1 %2190  ;;  %v2176_v42 = vpop.permute.xlu0 %2175  ;;  %v1486_v14 = vsel %vm1485_vm3, %v1477_v2, %v2142_v41  ;;  %v1487_v37 = vsel %vm1485_vm3, %v1478_v35, %v2143_v40  ;;  %v2188_v2 = vunpack.i.h.bf16 %v2976_v46  ;;  %v2187_v35 = vunpack.i.l.bf16 %v2976_v46  ;;  %vm3273_vm11 = vmmov %vm3266_vm0 }
 0x29f   : > { %v2178_v38 = vunpack.i.h.bf16 %v2176_v42  ;;  %v2177_v44 = vunpack.i.l.bf16 %v2176_v42  ;;  %v2193_v15 = vunpack.i.h.bf16 %v2191_v34  ;;  %v2192_v57 = vunpack.i.l.bf16 %v2191_v34 }
 0x2a0   : > { %v1130_v46 = vsel %vm2583_vm6, %v2916_v28, 0.0  ;;  %v1439_v61 = vsel %vm3258_vm12, %v1127_v60, %v2187_v35  ;;  %v1440_v58 = vsel %vm3265_vm9, %v1128_v39, %v2188_v2  ;;  %vm3267_vm6 = vmmov %vm3266_vm0 }
 0x2a1   : > { %v1495_v5 = vsel %vm1494_vm4, %v1486_v14, %v2177_v44  ;;  %v1496_v47 = vsel %vm1494_vm4, %v1487_v37, %v2178_v38  ;;  %v1471_v48 = vsel %vm1467_vm5, %v1462_v62, %v2193_v15  ;;  %v1470_v25 = vsel %vm1467_vm5, %v1461_v22, %v2192_v57  ;;  %vm3274_vm12 = vmmov %vm3264_vm15 }
 0x2a2   : > { %v2196_v36 = vpop.permute.xlu1 %2195  ;;  %v3002_v9 = vpop.permute.xlu0 %2220  ;;  %v1503_v7 = vpack.c.bf16 %v1496_v47, %v1495_v5  ;;  %vm3275_vm9 = vmmov %vm3268_vm1 }
 0x2a3   : > { %v2198_v21 = vunpack.i.h.bf16 %v2196_v36  ;;  %v2197_v0 = vunpack.i.l.bf16 %v2196_v36  ;;  %v2223_v55 = vunpack.i.h.bf16 %v3002_v9  ;;  %v2222_v32 = vunpack.i.l.bf16 %v3002_v9 }
 0x2a4   : > { %1887 = vmatprep.mubr.msk.bf16.mxu1 %vm1543_vm14, %v1503_v7 }
 0x2a5   : > { %v1480_v27 = vsel %vm1476_vm13, %v1471_v48, %v2198_v21  ;;  %v1479_v59 = vsel %vm1476_vm13, %v1470_v25, %v2197_v0 }
 0x2a6   : > { %v3009_v18 = vpop.permute.xlu1 %2200  ;;  %v3013_v63 = vpop.permute.xlu0 %2225  ;;  %v1488_v30 = vsel %vm1485_vm3, %v1479_v59, %v2182_v54  ;;  %v1489_v31 = vsel %vm1485_vm3, %v1480_v27, %v2183_v1 }
 0x2a7   : > { %v2203_v3 = vunpack.i.h.bf16 %v3009_v18  ;;  %v2202_v13 = vunpack.i.l.bf16 %v3009_v18  ;;  %v2228_v45 = vunpack.i.h.bf16 %v3013_v63  ;;  %v2227_v5 = vunpack.i.l.bf16 %v3013_v63 }
 0x2aa   : > { %v3019_v23 = vpop.permute.xlu1 %2205  ;;  %v2231_v49 = vpop.permute.xlu0 %2230 }
 0x2ab   : > { %v2233_v19 = vunpack.i.h.bf16 %v2231_v49  ;;  %v2232_v29 = vunpack.i.l.bf16 %v2231_v49  ;;  %v2208_v53 = vunpack.i.h.bf16 %v3019_v23  ;;  %v2207_v9 = vunpack.i.l.bf16 %v3019_v23 }
 0x2ad   : > { %v1498_v26 = vsel %vm1494_vm4, %v1489_v31, %v2233_v19  ;;  %v1497_v33 = vsel %vm1494_vm4, %v1488_v30, %v2232_v29 }
 0x2ae   : > { %v3027_v50 = vpop.permute.xlu1 %2210  ;;  %v1504_v56 = vpack.c.bf16 %v1498_v26, %v1497_v33  ;;  %v2236_v34 = vpop.permute.xlu0 %2235 }
 0x2af   : > { %v2238_v40 = vunpack.i.h.bf16 %v2236_v34  ;;  %v2237_v41 = vunpack.i.l.bf16 %v2236_v34  ;;  %v2213_v54 = vunpack.i.h.bf16 %v3027_v50  ;;  %v2212_v49 = vunpack.i.l.bf16 %v3027_v50 }
 0x2b0   : > { %1888 = vmatmul.mubr.msk.bf16.vlgmr.msra.gmra.mxu1 %vm1543_vm14, %v1504_v56 }
 0x2b1   : > { %v1448_v6 = vsel %vm3266_vm0, %v1440_v58, %v2238_v40  ;;  %v1447_v28 = vsel %vm3267_vm6, %v1439_v61, %v2237_v41  ;;  %vm3276_vm0 = vmmov %vm3268_vm1 }
 0x2b2   : > { %v2216_v20 = vpop.permute.xlu1 %2215  ;;  %v2246_v42 = vpop.permute.xlu0 %2245  ;;  %vm3277_vm6 = vmmov %vm3274_vm12 }
 0x2b3   : > { %v2248_v51 = vunpack.i.h.bf16 %v2246_v42  ;;  %v2247_v38 = vunpack.i.l.bf16 %v2246_v42  ;;  %v2218_v8 = vunpack.i.h.bf16 %v2216_v20  ;;  %v2217_v4 = vunpack.i.l.bf16 %v2216_v20 }
 0x2b5   : > { %v1456_v47 = vsel %vm3268_vm1, %v1448_v6, %v2248_v51  ;;  %v1455_v52 = vsel %vm3269_vm10, %v1447_v28, %v2247_v38  ;;  %v1441_v17 = vsel %vm3270_vm2, %v1129_v10, %v2217_v4  ;;  %v1442_v11 = vsel %vm3271_vm8, %v1130_v46, %v2218_v8  ;;  %vm3278_vm1 = vmmov %vm3277_vm6 }
 0x2b6   : > { %v2241_v44 = vpop.permute.xlu1 %2240  ;;  %v2261_v37 = vpop.permute.xlu0 %2260  ;;  %v1463_v12 = vsel %vm3264_vm15, %v1455_v52, %v2222_v32  ;;  %v1464_v21 = vsel %vm3274_vm12, %v1456_v47, %v2223_v55  ;;  %v1786_v32 = vld [vmem:[%s3126_s5] ss:$0 sm:$0xff] }
 0x2b7   : > { %v2243_v36 = vunpack.i.h.bf16 %v2241_v44  ;;  %v2242_v14 = vunpack.i.l.bf16 %v2241_v44  ;;  %v2263_v7 = vunpack.i.h.bf16 %v2261_v37  ;;  %v2262_v16 = vunpack.i.l.bf16 %v2261_v37 }
 0x2b9   : > { %v1449_v18 = vsel %vm3272_vm7, %v1441_v17, %v2242_v14  ;;  %v1450_v43 = vsel %vm3273_vm11, %v1442_v11, %v2243_v36  ;;  %v1472_v25 = vsel %vm1467_vm5, %v1463_v12, %v2262_v16  ;;  %v1473_v23 = vsel %vm1467_vm5, %v1464_v21, %v2263_v7 }
 0x2ba   : > { %v2251_v24 = vpop.permute.xlu1 %2250  ;;  %v2266_v0 = vpop.permute.xlu0 %2265 }
 0x2bb   : > { %v2253_v15 = vunpack.i.h.bf16 %v2251_v24  ;;  %v2252_v57 = vunpack.i.l.bf16 %v2251_v24  ;;  %v2268_v62 = vunpack.i.h.bf16 %v2266_v0  ;;  %v2267_v48 = vunpack.i.l.bf16 %v2266_v0 }
 0x2bd   : > { %v1457_v63 = vsel %vm3275_vm9, %v1449_v18, %v2252_v57  ;;  %v1458_v22 = vsel %vm3276_vm0, %v1450_v43, %v2253_v15  ;;  %v1481_v19 = vsel %vm1476_vm13, %v1472_v25, %v2267_v48  ;;  %v1482_v29 = vsel %vm1476_vm13, %v1473_v23, %v2268_v62 }
 0x2be   : > { %v1465_v27 = vsel %vm3277_vm6, %v1457_v63, %v2202_v13  ;;  %v1466_v59 = vsel %vm3278_vm1, %v1458_v22, %v2203_v3  ;;  %v2256_v1 = vpop.permute.xlu1 %2255  ;;  %v2271_v56 = vpop.permute.xlu0 %2270  ;;  %v1490_v60 = vsel %vm1485_vm3, %v1481_v19, %v2227_v5  ;;  %v1491_v50 = vsel %vm1485_vm3, %v1482_v29, %v2228_v45  ;;  %v1787_v3 = vld [vmem:[%s3127_s6] ss:$0 sm:$0xff] }
 0x2bf   : > { %v2258_v30 = vunpack.i.h.bf16 %v2256_v1  ;;  %v2257_v31 = vunpack.i.l.bf16 %v2256_v1  ;;  %v1474_v26 = vsel %vm1467_vm5, %v1465_v27, %v2207_v9  ;;  %v1475_v33 = vsel %vm1467_vm5, %v1466_v59, %v2208_v53 }
 0x2c0   : > { %v1483_v34 = vsel %vm1476_vm13, %v1474_v26, %v2212_v49  ;;  %v1484_v2 = vsel %vm1476_vm13, %v1475_v33, %v2213_v54  ;;  %v2273_v35 = vunpack.i.h.bf16 %v2271_v56  ;;  %v2272_v20 = vunpack.i.l.bf16 %v2271_v56 }
 0x2c1   : > { %v1492_v46 = vsel %vm1485_vm3, %v1483_v34, %v2257_v31  ;;  %v1493_v51 = vsel %vm1485_vm3, %v1484_v2, %v2258_v30  ;;  %vm1695_vm5 = vcmask 60416  }
 0x2c2   : > { %v2276_v39 = vpop.permute.xlu1 %2275  ;;  %v1499_v40 = vsel %vm1494_vm4, %v1490_v60, %v2272_v20  ;;  %v1500_v41 = vsel %vm1494_vm4, %v1491_v50, %v2273_v35 }
 0x2c3   : > { %v2278_v42 = vunpack.i.h.bf16 %v2276_v39  ;;  %v2277_v10 = vunpack.i.l.bf16 %v2276_v39  ;;  %v1505_v38 = vpack.c.bf16 %v1500_v41, %v1499_v40 }
 0x2c5   : > { %v1501_v61 = vsel %vm1494_vm4, %v1492_v46, %v2277_v10  ;;  %v1502_v58 = vsel %vm1494_vm4, %v1493_v51, %v2278_v42  ;;  %1891 = vmatprep.mubr.msk.bf16.mxu1 %vm1543_vm14, %v1505_v38 }
 0x2c6   : > { %v1506_v55 = vpack.c.bf16 %v1502_v58, %v1501_v61 }
 0x2c8   : > { %1892 = vmatmul.mubr.msk.bf16.gmra.mxu1 %vm1543_vm14, %v1506_v55 }
 0x370   : > { %v1889_v44 = vpop.f32.mrf.mxu1 }
 0x371   : > { %v1634_v13 = vmul.f32 %v1889_v44, %v1786_v32 }
 0x372   : > { %v1594_v8 = vpop.f32.mrf.mxu1 }
 0x373   : > { %v1649_v4 = vadd.f32 %v1787_v3, %v1634_v13  ;;  %v1632_v6 = vmul.f32 %v1786_v32, %v1594_v8 }
 0x374   : > { %v1890_v28 = vpop.f32.mrf.mxu1 }
 0x375   : > { %v1657_v36 = vmax.f32 %v1649_v4, 0.0  ;;  %v1647_v14 = vadd.f32 %v1787_v3, %v1632_v6  ;;  %v1635_v37 = vmul.f32 %v1890_v28, %v1786_v32 }
 0x376   : > { %v1597_v45 = vpop.f32.mrf.mxu1 }
 0x377   : > { %v1802_v5 = vpack.c.bf16 %v1657_v36, %v1657_v36  ;;  %v1655_v47 = vmax.f32 %v1647_v14, 0.0  ;;  %v1650_v52 = vadd.f32 %v1787_v3, %v1635_v37  ;;  %v1633_v53 = vmul.f32 %v1786_v32, %v1597_v45 }
 0x379   : > { %1698 = vst.msk [vmem:[%s3100_s28 + $0x8] sm:$0xf] %vm1695_vm5, %v1802_v5  ;;  %v1800_v9 = vpack.c.bf16 %v1655_v47, %v1655_v47  ;;  %v1658_v7 = vmax.f32 %v1650_v52, 0.0  ;;  %v1648_v16 = vadd.f32 %v1787_v3, %v1633_v53 }
 0x37b   : > { %1696 = vst.msk [vmem:[%s3100_s28] sm:$0xf] %vm1695_vm5, %v1800_v9  ;;  %v1803_v24 = vpack.c.bf16 %v1658_v7, %v1658_v7  ;;  %v1656_v17 = vmax.f32 %v1648_v16, 0.0 }
 0x37d   : > { %1699 = vst.msk [vmem:[%s3100_s28 + $0xc] sm:$0xf] %vm1695_vm5, %v1803_v24  ;;  %v1801_v11 = vpack.c.bf16 %v1656_v17, %v1656_v17 }
 0x37f   : > { %1697 = vst.msk [vmem:[%s3100_s28 + $0x4] sm:$0xf] %vm1695_vm5, %v1801_v11 }
 0x388   : > { %v1893_v15 = vpop.f32.mrf.mxu1 }
 0x389   : > { %v1638_v57 = vmul.f32 %v1893_v15, %v1786_v32 }
 0x38a   : > { %v1610_v18 = vpop.f32.mrf.mxu1 }
 0x38b   : > { %v1653_v43 = vadd.f32 %v1787_v3, %v1638_v57  ;;  %v1636_v12 = vmul.f32 %v1786_v32, %v1610_v18 }
 0x38c   : > { %v1894_v21 = vpop.f32.mrf.mxu1 }
 0x38d   : > { %v1661_v0 = vmax.f32 %v1653_v43, 0.0  ;;  %v1651_v63 = vadd.f32 %v1787_v3, %v1636_v12  ;;  %v1639_v22 = vmul.f32 %v1894_v21, %v1786_v32 }
 0x38e   : > { %v1613_v62 = vpop.f32.mrf.mxu1 }
 0x38f   : > { %v1806_v48 = vpack.c.bf16 %v1661_v0, %v1661_v0  ;;  %v1659_v25 = vmax.f32 %v1651_v63, 0.0  ;;  %v1654_v23 = vadd.f32 %v1787_v3, %v1639_v22  ;;  %v1637_v27 = vmul.f32 %v1786_v32, %v1613_v62 }
 0x391   : > { %1702 = vst.msk [vmem:[%s3100_s28 + $0x18] sm:$0xf] %vm1695_vm5, %v1806_v48  ;;  %v1804_v59 = vpack.c.bf16 %v1659_v25, %v1659_v25  ;;  %v1662_v1 = vmax.f32 %v1654_v23, 0.0  ;;  %v1652_v54 = vadd.f32 %v1787_v3, %v1637_v27 }
 0x393   : > { %1700 = vst.msk [vmem:[%s3100_s28 + $0x10] sm:$0xf] %vm1695_vm5, %v1804_v59  ;;  %v1807_v49 = vpack.c.bf16 %v1662_v1, %v1662_v1  ;;  %v1660_v19 = vmax.f32 %v1652_v54, 0.0 }
 0x395   : > { %1703 = vst.msk [vmem:[%s3100_s28 + $0x1c] sm:$0xf] %vm1695_vm5, %v1807_v49  ;;  %v1805_v29 = vpack.c.bf16 %v1660_v19, %v1660_v19 }
 0x397   : > { %1701 = vst.msk [vmem:[%s3100_s28 + $0x14] sm:$0xf] %vm1695_vm5, %v1805_v29 }
 0x398 PF: > { %s17_s24 = sadd.s32 1, %s2293_s24  }
 0x399   : > { %p14_p4 = scmp.ge.s32.totalorder %s17_s24, 4  }
 0x39b   :  { %16 = sbr.rel (!%p14_p4) target bundleno = 1 (0x1), region = 78 }

</bundles_post_ra>
